<compile_context>
chip_gen: v6e
topology: v6e:2x2x1
jax: 0.10.0
libtpu: 0.0.40
codegen_flags: <defaults>
</compile_context>

<pallas_src>
import functools

import jax
import jax.numpy as jnp
from jax import lax
from jax.experimental import pallas as pl
from jax.experimental.pallas import tpu as pltpu


def lstm_kernel(x_ref,          # (T*B, E)  f32 time-major embeddings (flattened)
                wih_cat_ref,    # (E, 8H)   bf16  [W_ih_fwd | W_ih_bwd]
                b_cat_ref,      # (1, 8H)   f32   [b_fwd | b_bwd]  (b_ih + b_hh each)
                whh_f_ref,      # (H, 4H)   bf16  forward W_hh
                wfc_f_ref,      # (H, 2)    f32   final linear, forward half
                wfc_b_ref,      # (H, 2)    f32   final linear, backward half
                bfc_ref,        # (1, 2)    f32
                out_ref,        # (B, 2)    f32
                proj_ref,       # VMEM scratch: (T*B, 8H) f32
                *, T, B, H):
    # ---- hoisted input projection (both directions) : one MXU matmul ----
    x_bf = x_ref[...].astype(jnp.bfloat16)
    proj_ref[...] = (jnp.dot(x_bf, wih_cat_ref[...],
                             preferred_element_type=jnp.float32)
                     + b_cat_ref[...])

    whh_f = whh_f_ref[...]                               # loop-invariant, bf16

    # ---- forward recurrence, fully unrolled; h/c are register-resident ----
    h = jnp.zeros((B, H), jnp.float32)
    c = jnp.zeros((B, H), jnp.float32)
    for t in range(T):                                   # T is a static constant
        gx = proj_ref[t * B:(t + 1) * B, 0:4 * H]        # static (B, 4H) slice
        gates = gx + jnp.dot(h.astype(jnp.bfloat16), whh_f,
                             preferred_element_type=jnp.float32)
        i = jax.nn.sigmoid(gates[:, 0 * H:1 * H])
        f = jax.nn.sigmoid(gates[:, 1 * H:2 * H])
        g = jnp.tanh(gates[:, 2 * H:3 * H])
        o = jax.nn.sigmoid(gates[:, 3 * H:4 * H])
        c = f * c + i * g
        h = o * jnp.tanh(c)

    # ---- reverse direction ----
    # Only r_out[:, -1, H:] is consumed: the backward LSTM sees x_{T-1} first, so
    # its output at position T-1 is one cell step from the zero state. Its input
    # projection is already in proj_ref (backward half, last time block), and the
    # h_prev @ W_hh_bwd term is exactly zero, so W_hh_bwd never enters the kernel.
    gb = proj_ref[(T - 1) * B:T * B, 4 * H:8 * H]
    i_b = jax.nn.sigmoid(gb[:, 0 * H:1 * H])
    g_b = jnp.tanh(gb[:, 2 * H:3 * H])
    o_b = jax.nn.sigmoid(gb[:, 3 * H:4 * H])
    h_b = o_b * jnp.tanh(i_b * g_b)                      # c_b = f_b*0 + i_b*g_b

    # ---- final Linear(2H, 2) as two (H, 2) matmuls summed (no lane concat) ----
    # TODO(synk): nn.Dropout(0.3) is identity in eval mode; training-mode random
    # masking is intentionally not reproduced.
    out = (jnp.dot(h, wfc_f_ref[...], preferred_element_type=jnp.float32)
           + jnp.dot(h_b, wfc_b_ref[...], preferred_element_type=jnp.float32)
           + bfc_ref[...])
    out_ref[...] = out.astype(out_ref.dtype)


def lstm_forward(r_input, params):
    """r_input: (B, T) int32 token ids. Returns (B, 2) f32 logits."""
    emb_w = params["embedding"]                 # (V, E)
    B, T = r_input.shape
    E = emb_w.shape[1]
    H = params["whh_f"].shape[0]
    B_pad = ((B + 7) // 8) * 8                  # pad batch to a full sublane group

    # Embedding gather is glue; done in plain JAX.
    embeds = emb_w[r_input]                     # (B, T, E)
    x = jnp.transpose(embeds, (1, 0, 2))        # (T, B, E) time-major
    if B_pad != B:
        x = jnp.pad(x, ((0, 0), (0, B_pad - B), (0, 0)))
    x2d = x.reshape(T * B_pad, E).astype(jnp.float32)

    # bf16 matmul operands (f32 accumulation inside the kernel); biases stay f32.
    wih_cat = jnp.concatenate([params["wih_f"], params["wih_b"]],
                              axis=1).astype(jnp.bfloat16)          # (E, 8H)
    b_cat = jnp.concatenate([params["b_f"], params["b_b"]], axis=1)  # (1, 8H)
    whh_f = params["whh_f"].astype(jnp.bfloat16)                     # (H, 4H)
    wfc_f = params["wfc"][:H, :]                                     # (H, 2)
    wfc_b = params["wfc"][H:, :]                                     # (H, 2)

    vmem = lambda: pl.BlockSpec(memory_space=pltpu.MemorySpace.VMEM)
    kernel = functools.partial(lstm_kernel, T=T, B=B_pad, H=H)
    out = pl.pallas_call(
        kernel,
        out_shape=jax.ShapeDtypeStruct((B_pad, 2), jnp.float32),
        in_specs=[vmem() for _ in range(7)],
        out_specs=vmem(),
        scratch_shapes=[pltpu.VMEM((T * B_pad, 8 * H), jnp.float32)],
    )(x2d, wih_cat, b_cat, whh_f, wfc_f, wfc_b, params["bfc"])
    return out[:B]


def init_params(key, voc_size, word_size, hidden_size):
    """Deterministic synthetic parameters matching PyTorch shapes (then transposed)."""
    H, E = hidden_size, word_size
    ks = jax.random.split(key, 11)
    bound = 1.0 / (H ** 0.5)

    def u(k, shape, b=bound):
        return jax.random.uniform(k, shape, jnp.float32, -b, b)

    emb = jax.random.normal(ks[0], (voc_size, E), jnp.float32)   # torch.randn(voc, word)
    # nn.LSTM: weight_ih (4H,E), weight_hh (4H,H), bias_ih (4H,), bias_hh (4H,)
    wih_f = u(ks[1], (4 * H, E)).T                               # -> (E, 4H)
    whh_f = u(ks[2], (4 * H, H)).T                               # -> (H, 4H)
    b_f = (u(ks[3], (4 * H,)) + u(ks[4], (4 * H,))).reshape(1, 4 * H)
    wih_b = u(ks[5], (4 * H, E)).T
    whh_b = u(ks[6], (4 * H, H)).T
    b_b = (u(ks[7], (4 * H,)) + u(ks[8], (4 * H,))).reshape(1, 4 * H)
    # nn.Linear(256, 2): weight (2, 256), bias (2,)
    fc_bound = 1.0 / ((2 * H) ** 0.5)
    wfc = u(ks[9], (2, 2 * H), fc_bound).T                       # -> (2H, 2)
    bfc = u(ks[10], (2,), fc_bound).reshape(1, 2)
    return dict(embedding=emb, wih_f=wih_f, whh_f=whh_f, b_f=b_f,
                wih_b=wih_b, whh_b=whh_b, b_b=b_b, wfc=wfc, bfc=bfc)


def reference_forward(r_input, params):
    """Pure-JAX f32 reference for validation (full bidirectional scan)."""
    emb = params["embedding"][r_input]          # (B, T, E)
    B, T, E = emb.shape
    H = params["whh_f"].shape[0]

    def scan_dir(x_seq, wih, whh, b):
        def step(carry, x_t):
            h, c = carry
            gates = x_t @ wih + h @ whh + b
            i = jax.nn.sigmoid(gates[:, :H])
            f = jax.nn.sigmoid(gates[:, H:2 * H])
            g = jnp.tanh(gates[:, 2 * H:3 * H])
            o = jax.nn.sigmoid(gates[:, 3 * H:])
            c = f * c + i * g
            h = o * jnp.tanh(c)
            return (h, c), h
        init = (jnp.zeros((B, H), jnp.float32), jnp.zeros((B, H), jnp.float32))
        _, hs = lax.scan(step, init, jnp.transpose(x_seq, (1, 0, 2)))
        return hs                                # (T, B, H)

    hs_f = scan_dir(emb, params["wih_f"], params["whh_f"], params["b_f"])
    hs_b = scan_dir(emb[:, ::-1, :], params["wih_b"], params["whh_b"], params["b_b"])
    hs_b = hs_b[::-1]                            # re-align to forward time order
    r_out_last = jnp.concatenate([hs_f[-1], hs_b[-1]], axis=1)   # (B, 2H)
    return r_out_last @ params["wfc"] + params["bfc"]


if __name__ == "__main__":
    # hidden_size = 128 is forced by the module's hardcoded nn.Linear(256, 2).
    B, T, E, H, V = 2, 8, 32, 128, 50
    key = jax.random.PRNGKey(0)
    k_in, k_p = jax.random.split(key)
    r_input = jax.random.randint(k_in, (B, T), 0, V, dtype=jnp.int32)
    params = init_params(k_p, voc_size=V, word_size=E, hidden_size=H)

    out = lstm_forward(r_input, params)
    out = jax.block_until_ready(out)
    assert out.shape == (B, 2)

    ref = reference_forward(r_input, params)
    # bf16 matmul operands (f32 accumulate) add ~1e-3 of noise vs the f32 reference.
    assert jnp.allclose(out, ref, atol=5e-3, rtol=5e-3), (out, ref)

    print("KERNEL_OK")
</pallas_src>

<mosaic_0001>
module attributes {stable_mosaic.version = 11 : i64} {
  func.func @lstm_kernel(%arg0: memref<64x32xf32, #tpu.memory_space<vmem>>, %arg1: memref<32x1024xbf16, #tpu.memory_space<vmem>>, %arg2: memref<1x1024xf32, #tpu.memory_space<vmem>>, %arg3: memref<128x512xbf16, #tpu.memory_space<vmem>>, %arg4: memref<128x2xf32, #tpu.memory_space<vmem>>, %arg5: memref<128x2xf32, #tpu.memory_space<vmem>>, %arg6: memref<1x2xf32, #tpu.memory_space<vmem>>, %arg7: memref<8x2xf32, #tpu.memory_space<vmem>>, %arg8: memref<64x1024xf32, #tpu.memory_space<vmem>>) attributes {dimension_semantics = [], scalar_prefetch = 0 : i64, scratch_operands = 1 : i64, tpu.core_type = #tpu.core_type<tc>} {
    %c0 = arith.constant 0 : index
    %c0_0 = arith.constant 0 : index
    %0 = vector.load %arg0[%c0, %c0_0] : memref<64x32xf32, #tpu.memory_space<vmem>>, vector<64x32xf32>
    %1 = arith.truncf %0 : vector<64x32xf32> to vector<64x32xbf16>
    %c0_1 = arith.constant 0 : index
    %c0_2 = arith.constant 0 : index
    %2 = vector.load %arg1[%c0_1, %c0_2] : memref<32x1024xbf16, #tpu.memory_space<vmem>>, vector<32x1024xbf16>
    %cst = arith.constant dense<0.000000e+00> : vector<64x1024xf32>
    %3 = tpu.matmul %1, %2, %cst {dimension_numbers = #tpu.dot_dimension_numbers<[1], [0], [0], [1], [0, 0, 1, 1], [], []>} : vector<64x32xbf16>, vector<32x1024xbf16>, vector<64x1024xf32> -> vector<64x1024xf32>
    %c0_3 = arith.constant 0 : index
    %c0_4 = arith.constant 0 : index
    %4 = vector.load %arg2[%c0_3, %c0_4] : memref<1x1024xf32, #tpu.memory_space<vmem>>, vector<1x1024xf32>
    %5 = vector.broadcast %4 : vector<1x1024xf32> to vector<64x1024xf32>
    %6 = arith.addf %3, %5 : vector<64x1024xf32>
    %c0_5 = arith.constant 0 : index
    %c0_6 = arith.constant 0 : index
    %7 = vector.load %arg8[%c0_5, %c0_6] : memref<64x1024xf32, #tpu.memory_space<vmem>>, vector<64x1024xf32>
    tpu.vector_store %arg8[%c0_5, %c0_6], %6 {strides = array<i32>} : memref<64x1024xf32, #tpu.memory_space<vmem>>, vector<64x1024xf32>,
    %c0_7 = arith.constant 0 : index
    %c0_8 = arith.constant 0 : index
    %8 = vector.load %arg3[%c0_7, %c0_8] : memref<128x512xbf16, #tpu.memory_space<vmem>>, vector<128x512xbf16>
    %cst_9 = arith.constant 0.000000e+00 : f32
    %9 = vector.broadcast %cst_9 : f32 to vector<8x128xf32>
    %cst_10 = arith.constant 0.000000e+00 : f32
    %10 = vector.broadcast %cst_10 : f32 to vector<8x128xf32>
    %c0_11 = arith.constant 0 : index
    %c0_12 = arith.constant 0 : index
    %11 = vector.load %arg8[%c0_11, %c0_12] : memref<64x1024xf32, #tpu.memory_space<vmem>>, vector<8x512xf32>
    %12 = arith.truncf %9 : vector<8x128xf32> to vector<8x128xbf16>
    %cst_13 = arith.constant dense<0.000000e+00> : vector<8x512xf32>
    %13 = tpu.matmul %12, %8, %cst_13 {dimension_numbers = #tpu.dot_dimension_numbers<[1], [0], [0], [1], [0, 0, 1, 1], [], []>} : vector<8x128xbf16>, vector<128x512xbf16>, vector<8x512xf32> -> vector<8x512xf32>
    %14 = arith.addf %11, %13 : vector<8x512xf32>
    %15 = vector.extract_strided_slice %14 {offsets = [0, 0], sizes = [8, 128], strides = [1, 1]} : vector<8x512xf32> to vector<8x128xf32>
    %16 = arith.negf %15 : vector<8x128xf32>
    %17 = math.exp %16 : vector<8x128xf32>
    %cst_14 = arith.constant 1.000000e+00 : f32
    %18 = vector.broadcast %cst_14 : f32 to vector<8x128xf32>
    %19 = arith.addf %18, %17 : vector<8x128xf32>
    %20 = arith.divf %18, %19 : vector<8x128xf32>
    %21 = vector.extract_strided_slice %14 {offsets = [0, 128], sizes = [8, 128], strides = [1, 1]} : vector<8x512xf32> to vector<8x128xf32>
    %22 = arith.negf %21 : vector<8x128xf32>
    %23 = math.exp %22 : vector<8x128xf32>
    %cst_15 = arith.constant 1.000000e+00 : f32
    %24 = vector.broadcast %cst_15 : f32 to vector<8x128xf32>
    %25 = arith.addf %24, %23 : vector<8x128xf32>
    %26 = arith.divf %24, %25 : vector<8x128xf32>
    %27 = vector.extract_strided_slice %14 {offsets = [0, 256], sizes = [8, 128], strides = [1, 1]} : vector<8x512xf32> to vector<8x128xf32>
    %28 = math.tanh %27 : vector<8x128xf32>
    %29 = vector.extract_strided_slice %14 {offsets = [0, 384], sizes = [8, 128], strides = [1, 1]} : vector<8x512xf32> to vector<8x128xf32>
    %30 = arith.negf %29 : vector<8x128xf32>
    %31 = math.exp %30 : vector<8x128xf32>
    %cst_16 = arith.constant 1.000000e+00 : f32
    %32 = vector.broadcast %cst_16 : f32 to vector<8x128xf32>
    %33 = arith.addf %32, %31 : vector<8x128xf32>
    %34 = arith.divf %32, %33 : vector<8x128xf32>
    %35 = arith.mulf %26, %10 : vector<8x128xf32>
    %36 = arith.mulf %20, %28 : vector<8x128xf32>
    %37 = arith.addf %35, %36 : vector<8x128xf32>
    %38 = math.tanh %37 : vector<8x128xf32>
    %39 = arith.mulf %34, %38 : vector<8x128xf32>
    %c8 = arith.constant 8 : index
    %c0_17 = arith.constant 0 : index
    %40 = vector.load %arg8[%c8, %c0_17] : memref<64x1024xf32, #tpu.memory_space<vmem>>, vector<8x512xf32>
    %41 = arith.truncf %39 : vector<8x128xf32> to vector<8x128xbf16>
    %cst_18 = arith.constant dense<0.000000e+00> : vector<8x512xf32>
    %42 = tpu.matmul %41, %8, %cst_18 {dimension_numbers = #tpu.dot_dimension_numbers<[1], [0], [0], [1], [0, 0, 1, 1], [], []>} : vector<8x128xbf16>, vector<128x512xbf16>, vector<8x512xf32> -> vector<8x512xf32>
    %43 = arith.addf %40, %42 : vector<8x512xf32>
    %44 = vector.extract_strided_slice %43 {offsets = [0, 0], sizes = [8, 128], strides = [1, 1]} : vector<8x512xf32> to vector<8x128xf32>
    %45 = arith.negf %44 : vector<8x128xf32>
    %46 = math.exp %45 : vector<8x128xf32>
    %cst_19 = arith.constant 1.000000e+00 : f32
    %47 = vector.broadcast %cst_19 : f32 to vector<8x128xf32>
    %48 = arith.addf %47, %46 : vector<8x128xf32>
    %49 = arith.divf %47, %48 : vector<8x128xf32>
    %50 = vector.extract_strided_slice %43 {offsets = [0, 128], sizes = [8, 128], strides = [1, 1]} : vector<8x512xf32> to vector<8x128xf32>
    %51 = arith.negf %50 : vector<8x128xf32>
    %52 = math.exp %51 : vector<8x128xf32>
    %cst_20 = arith.constant 1.000000e+00 : f32
    %53 = vector.broadcast %cst_20 : f32 to vector<8x128xf32>
    %54 = arith.addf %53, %52 : vector<8x128xf32>
    %55 = arith.divf %53, %54 : vector<8x128xf32>
    %56 = vector.extract_strided_slice %43 {offsets = [0, 256], sizes = [8, 128], strides = [1, 1]} : vector<8x512xf32> to vector<8x128xf32>
    %57 = math.tanh %56 : vector<8x128xf32>
    %58 = vector.extract_strided_slice %43 {offsets = [0, 384], sizes = [8, 128], strides = [1, 1]} : vector<8x512xf32> to vector<8x128xf32>
    %59 = arith.negf %58 : vector<8x128xf32>
    %60 = math.exp %59 : vector<8x128xf32>
    %cst_21 = arith.constant 1.000000e+00 : f32
    %61 = vector.broadcast %cst_21 : f32 to vector<8x128xf32>
    %62 = arith.addf %61, %60 : vector<8x128xf32>
    %63 = arith.divf %61, %62 : vector<8x128xf32>
    %64 = arith.mulf %55, %37 : vector<8x128xf32>
    %65 = arith.mulf %49, %57 : vector<8x128xf32>
    %66 = arith.addf %64, %65 : vector<8x128xf32>
    %67 = math.tanh %66 : vector<8x128xf32>
    %68 = arith.mulf %63, %67 : vector<8x128xf32>
    %c16 = arith.constant 16 : index
    %c0_22 = arith.constant 0 : index
    %69 = vector.load %arg8[%c16, %c0_22] : memref<64x1024xf32, #tpu.memory_space<vmem>>, vector<8x512xf32>
    %70 = arith.truncf %68 : vector<8x128xf32> to vector<8x128xbf16>
    %cst_23 = arith.constant dense<0.000000e+00> : vector<8x512xf32>
    %71 = tpu.matmul %70, %8, %cst_23 {dimension_numbers = #tpu.dot_dimension_numbers<[1], [0], [0], [1], [0, 0, 1, 1], [], []>} : vector<8x128xbf16>, vector<128x512xbf16>, vector<8x512xf32> -> vector<8x512xf32>
    %72 = arith.addf %69, %71 : vector<8x512xf32>
    %73 = vector.extract_strided_slice %72 {offsets = [0, 0], sizes = [8, 128], strides = [1, 1]} : vector<8x512xf32> to vector<8x128xf32>
    %74 = arith.negf %73 : vector<8x128xf32>
    %75 = math.exp %74 : vector<8x128xf32>
    %cst_24 = arith.constant 1.000000e+00 : f32
    %76 = vector.broadcast %cst_24 : f32 to vector<8x128xf32>
    %77 = arith.addf %76, %75 : vector<8x128xf32>
    %78 = arith.divf %76, %77 : vector<8x128xf32>
    %79 = vector.extract_strided_slice %72 {offsets = [0, 128], sizes = [8, 128], strides = [1, 1]} : vector<8x512xf32> to vector<8x128xf32>
    %80 = arith.negf %79 : vector<8x128xf32>
    %81 = math.exp %80 : vector<8x128xf32>
    %cst_25 = arith.constant 1.000000e+00 : f32
    %82 = vector.broadcast %cst_25 : f32 to vector<8x128xf32>
    %83 = arith.addf %82, %81 : vector<8x128xf32>
    %84 = arith.divf %82, %83 : vector<8x128xf32>
    %85 = vector.extract_strided_slice %72 {offsets = [0, 256], sizes = [8, 128], strides = [1, 1]} : vector<8x512xf32> to vector<8x128xf32>
    %86 = math.tanh %85 : vector<8x128xf32>
    %87 = vector.extract_strided_slice %72 {offsets = [0, 384], sizes = [8, 128], strides = [1, 1]} : vector<8x512xf32> to vector<8x128xf32>
    %88 = arith.negf %87 : vector<8x128xf32>
    %89 = math.exp %88 : vector<8x128xf32>
    %cst_26 = arith.constant 1.000000e+00 : f32
    %90 = vector.broadcast %cst_26 : f32 to vector<8x128xf32>
    %91 = arith.addf %90, %89 : vector<8x128xf32>
    %92 = arith.divf %90, %91 : vector<8x128xf32>
    %93 = arith.mulf %84, %66 : vector<8x128xf32>
    %94 = arith.mulf %78, %86 : vector<8x128xf32>
    %95 = arith.addf %93, %94 : vector<8x128xf32>
    %96 = math.tanh %95 : vector<8x128xf32>
    %97 = arith.mulf %92, %96 : vector<8x128xf32>
    %c24 = arith.constant 24 : index
    %c0_27 = arith.constant 0 : index
    %98 = vector.load %arg8[%c24, %c0_27] : memref<64x1024xf32, #tpu.memory_space<vmem>>, vector<8x512xf32>
    %99 = arith.truncf %97 : vector<8x128xf32> to vector<8x128xbf16>
    %cst_28 = arith.constant dense<0.000000e+00> : vector<8x512xf32>
    %100 = tpu.matmul %99, %8, %cst_28 {dimension_numbers = #tpu.dot_dimension_numbers<[1], [0], [0], [1], [0, 0, 1, 1], [], []>} : vector<8x128xbf16>, vector<128x512xbf16>, vector<8x512xf32> -> vector<8x512xf32>
    %101 = arith.addf %98, %100 : vector<8x512xf32>
    %102 = vector.extract_strided_slice %101 {offsets = [0, 0], sizes = [8, 128], strides = [1, 1]} : vector<8x512xf32> to vector<8x128xf32>
    %103 = arith.negf %102 : vector<8x128xf32>
    %104 = math.exp %103 : vector<8x128xf32>
    %cst_29 = arith.constant 1.000000e+00 : f32
    %105 = vector.broadcast %cst_29 : f32 to vector<8x128xf32>
    %106 = arith.addf %105, %104 : vector<8x128xf32>
    %107 = arith.divf %105, %106 : vector<8x128xf32>
    %108 = vector.extract_strided_slice %101 {offsets = [0, 128], sizes = [8, 128], strides = [1, 1]} : vector<8x512xf32> to vector<8x128xf32>
    %109 = arith.negf %108 : vector<8x128xf32>
    %110 = math.exp %109 : vector<8x128xf32>
    %cst_30 = arith.constant 1.000000e+00 : f32
    %111 = vector.broadcast %cst_30 : f32 to vector<8x128xf32>
    %112 = arith.addf %111, %110 : vector<8x128xf32>
    %113 = arith.divf %111, %112 : vector<8x128xf32>
    %114 = vector.extract_strided_slice %101 {offsets = [0, 256], sizes = [8, 128], strides = [1, 1]} : vector<8x512xf32> to vector<8x128xf32>
    %115 = math.tanh %114 : vector<8x128xf32>
    %116 = vector.extract_strided_slice %101 {offsets = [0, 384], sizes = [8, 128], strides = [1, 1]} : vector<8x512xf32> to vector<8x128xf32>
    %117 = arith.negf %116 : vector<8x128xf32>
    %118 = math.exp %117 : vector<8x128xf32>
    %cst_31 = arith.constant 1.000000e+00 : f32
    %119 = vector.broadcast %cst_31 : f32 to vector<8x128xf32>
    %120 = arith.addf %119, %118 : vector<8x128xf32>
    %121 = arith.divf %119, %120 : vector<8x128xf32>
    %122 = arith.mulf %113, %95 : vector<8x128xf32>
    %123 = arith.mulf %107, %115 : vector<8x128xf32>
    %124 = arith.addf %122, %123 : vector<8x128xf32>
    %125 = math.tanh %124 : vector<8x128xf32>
    %126 = arith.mulf %121, %125 : vector<8x128xf32>
    %c32 = arith.constant 32 : index
    %c0_32 = arith.constant 0 : index
    %127 = vector.load %arg8[%c32, %c0_32] : memref<64x1024xf32, #tpu.memory_space<vmem>>, vector<8x512xf32>
    %128 = arith.truncf %126 : vector<8x128xf32> to vector<8x128xbf16>
    %cst_33 = arith.constant dense<0.000000e+00> : vector<8x512xf32>
    %129 = tpu.matmul %128, %8, %cst_33 {dimension_numbers = #tpu.dot_dimension_numbers<[1], [0], [0], [1], [0, 0, 1, 1], [], []>} : vector<8x128xbf16>, vector<128x512xbf16>, vector<8x512xf32> -> vector<8x512xf32>
    %130 = arith.addf %127, %129 : vector<8x512xf32>
    %131 = vector.extract_strided_slice %130 {offsets = [0, 0], sizes = [8, 128], strides = [1, 1]} : vector<8x512xf32> to vector<8x128xf32>
    %132 = arith.negf %131 : vector<8x128xf32>
    %133 = math.exp %132 : vector<8x128xf32>
    %cst_34 = arith.constant 1.000000e+00 : f32
    %134 = vector.broadcast %cst_34 : f32 to vector<8x128xf32>
    %135 = arith.addf %134, %133 : vector<8x128xf32>
    %136 = arith.divf %134, %135 : vector<8x128xf32>
    %137 = vector.extract_strided_slice %130 {offsets = [0, 128], sizes = [8, 128], strides = [1, 1]} : vector<8x512xf32> to vector<8x128xf32>
    %138 = arith.negf %137 : vector<8x128xf32>
    %139 = math.exp %138 : vector<8x128xf32>
    %cst_35 = arith.constant 1.000000e+00 : f32
    %140 = vector.broadcast %cst_35 : f32 to vector<8x128xf32>
    %141 = arith.addf %140, %139 : vector<8x128xf32>
    %142 = arith.divf %140, %141 : vector<8x128xf32>
    %143 = vector.extract_strided_slice %130 {offsets = [0, 256], sizes = [8, 128], strides = [1, 1]} : vector<8x512xf32> to vector<8x128xf32>
    %144 = math.tanh %143 : vector<8x128xf32>
    %145 = vector.extract_strided_slice %130 {offsets = [0, 384], sizes = [8, 128], strides = [1, 1]} : vector<8x512xf32> to vector<8x128xf32>
    %146 = arith.negf %145 : vector<8x128xf32>
    %147 = math.exp %146 : vector<8x128xf32>
    %cst_36 = arith.constant 1.000000e+00 : f32
    %148 = vector.broadcast %cst_36 : f32 to vector<8x128xf32>
    %149 = arith.addf %148, %147 : vector<8x128xf32>
    %150 = arith.divf %148, %149 : vector<8x128xf32>
    %151 = arith.mulf %142, %124 : vector<8x128xf32>
    %152 = arith.mulf %136, %144 : vector<8x128xf32>
    %153 = arith.addf %151, %152 : vector<8x128xf32>
    %154 = math.tanh %153 : vector<8x128xf32>
    %155 = arith.mulf %150, %154 : vector<8x128xf32>
    %c40 = arith.constant 40 : index
    %c0_37 = arith.constant 0 : index
    %156 = vector.load %arg8[%c40, %c0_37] : memref<64x1024xf32, #tpu.memory_space<vmem>>, vector<8x512xf32>
    %157 = arith.truncf %155 : vector<8x128xf32> to vector<8x128xbf16>
    %cst_38 = arith.constant dense<0.000000e+00> : vector<8x512xf32>
    %158 = tpu.matmul %157, %8, %cst_38 {dimension_numbers = #tpu.dot_dimension_numbers<[1], [0], [0], [1], [0, 0, 1, 1], [], []>} : vector<8x128xbf16>, vector<128x512xbf16>, vector<8x512xf32> -> vector<8x512xf32>
    %159 = arith.addf %156, %158 : vector<8x512xf32>
    %160 = vector.extract_strided_slice %159 {offsets = [0, 0], sizes = [8, 128], strides = [1, 1]} : vector<8x512xf32> to vector<8x128xf32>
    %161 = arith.negf %160 : vector<8x128xf32>
    %162 = math.exp %161 : vector<8x128xf32>
    %cst_39 = arith.constant 1.000000e+00 : f32
    %163 = vector.broadcast %cst_39 : f32 to vector<8x128xf32>
    %164 = arith.addf %163, %162 : vector<8x128xf32>
    %165 = arith.divf %163, %164 : vector<8x128xf32>
    %166 = vector.extract_strided_slice %159 {offsets = [0, 128], sizes = [8, 128], strides = [1, 1]} : vector<8x512xf32> to vector<8x128xf32>
    %167 = arith.negf %166 : vector<8x128xf32>
    %168 = math.exp %167 : vector<8x128xf32>
    %cst_40 = arith.constant 1.000000e+00 : f32
    %169 = vector.broadcast %cst_40 : f32 to vector<8x128xf32>
    %170 = arith.addf %169, %168 : vector<8x128xf32>
    %171 = arith.divf %169, %170 : vector<8x128xf32>
    %172 = vector.extract_strided_slice %159 {offsets = [0, 256], sizes = [8, 128], strides = [1, 1]} : vector<8x512xf32> to vector<8x128xf32>
    %173 = math.tanh %172 : vector<8x128xf32>
    %174 = vector.extract_strided_slice %159 {offsets = [0, 384], sizes = [8, 128], strides = [1, 1]} : vector<8x512xf32> to vector<8x128xf32>
    %175 = arith.negf %174 : vector<8x128xf32>
    %176 = math.exp %175 : vector<8x128xf32>
    %cst_41 = arith.constant 1.000000e+00 : f32
    %177 = vector.broadcast %cst_41 : f32 to vector<8x128xf32>
    %178 = arith.addf %177, %176 : vector<8x128xf32>
    %179 = arith.divf %177, %178 : vector<8x128xf32>
    %180 = arith.mulf %171, %153 : vector<8x128xf32>
    %181 = arith.mulf %165, %173 : vector<8x128xf32>
    %182 = arith.addf %180, %181 : vector<8x128xf32>
    %183 = math.tanh %182 : vector<8x128xf32>
    %184 = arith.mulf %179, %183 : vector<8x128xf32>
    %c48 = arith.constant 48 : index
    %c0_42 = arith.constant 0 : index
    %185 = vector.load %arg8[%c48, %c0_42] : memref<64x1024xf32, #tpu.memory_space<vmem>>, vector<8x512xf32>
    %186 = arith.truncf %184 : vector<8x128xf32> to vector<8x128xbf16>
    %cst_43 = arith.constant dense<0.000000e+00> : vector<8x512xf32>
    %187 = tpu.matmul %186, %8, %cst_43 {dimension_numbers = #tpu.dot_dimension_numbers<[1], [0], [0], [1], [0, 0, 1, 1], [], []>} : vector<8x128xbf16>, vector<128x512xbf16>, vector<8x512xf32> -> vector<8x512xf32>
    %188 = arith.addf %185, %187 : vector<8x512xf32>
    %189 = vector.extract_strided_slice %188 {offsets = [0, 0], sizes = [8, 128], strides = [1, 1]} : vector<8x512xf32> to vector<8x128xf32>
    %190 = arith.negf %189 : vector<8x128xf32>
    %191 = math.exp %190 : vector<8x128xf32>
    %cst_44 = arith.constant 1.000000e+00 : f32
    %192 = vector.broadcast %cst_44 : f32 to vector<8x128xf32>
    %193 = arith.addf %192, %191 : vector<8x128xf32>
    %194 = arith.divf %192, %193 : vector<8x128xf32>
    %195 = vector.extract_strided_slice %188 {offsets = [0, 128], sizes = [8, 128], strides = [1, 1]} : vector<8x512xf32> to vector<8x128xf32>
    %196 = arith.negf %195 : vector<8x128xf32>
    %197 = math.exp %196 : vector<8x128xf32>
    %cst_45 = arith.constant 1.000000e+00 : f32
    %198 = vector.broadcast %cst_45 : f32 to vector<8x128xf32>
    %199 = arith.addf %198, %197 : vector<8x128xf32>
    %200 = arith.divf %198, %199 : vector<8x128xf32>
    %201 = vector.extract_strided_slice %188 {offsets = [0, 256], sizes = [8, 128], strides = [1, 1]} : vector<8x512xf32> to vector<8x128xf32>
    %202 = math.tanh %201 : vector<8x128xf32>
    %203 = vector.extract_strided_slice %188 {offsets = [0, 384], sizes = [8, 128], strides = [1, 1]} : vector<8x512xf32> to vector<8x128xf32>
    %204 = arith.negf %203 : vector<8x128xf32>
    %205 = math.exp %204 : vector<8x128xf32>
    %cst_46 = arith.constant 1.000000e+00 : f32
    %206 = vector.broadcast %cst_46 : f32 to vector<8x128xf32>
    %207 = arith.addf %206, %205 : vector<8x128xf32>
    %208 = arith.divf %206, %207 : vector<8x128xf32>
    %209 = arith.mulf %200, %182 : vector<8x128xf32>
    %210 = arith.mulf %194, %202 : vector<8x128xf32>
    %211 = arith.addf %209, %210 : vector<8x128xf32>
    %212 = math.tanh %211 : vector<8x128xf32>
    %213 = arith.mulf %208, %212 : vector<8x128xf32>
    %c56 = arith.constant 56 : index
    %c0_47 = arith.constant 0 : index
    %214 = vector.load %arg8[%c56, %c0_47] : memref<64x1024xf32, #tpu.memory_space<vmem>>, vector<8x512xf32>
    %215 = arith.truncf %213 : vector<8x128xf32> to vector<8x128xbf16>
    %cst_48 = arith.constant dense<0.000000e+00> : vector<8x512xf32>
    %216 = tpu.matmul %215, %8, %cst_48 {dimension_numbers = #tpu.dot_dimension_numbers<[1], [0], [0], [1], [0, 0, 1, 1], [], []>} : vector<8x128xbf16>, vector<128x512xbf16>, vector<8x512xf32> -> vector<8x512xf32>
    %217 = arith.addf %214, %216 : vector<8x512xf32>
    %218 = vector.extract_strided_slice %217 {offsets = [0, 0], sizes = [8, 128], strides = [1, 1]} : vector<8x512xf32> to vector<8x128xf32>
    %219 = arith.negf %218 : vector<8x128xf32>
    %220 = math.exp %219 : vector<8x128xf32>
    %cst_49 = arith.constant 1.000000e+00 : f32
    %221 = vector.broadcast %cst_49 : f32 to vector<8x128xf32>
    %222 = arith.addf %221, %220 : vector<8x128xf32>
    %223 = arith.divf %221, %222 : vector<8x128xf32>
    %224 = vector.extract_strided_slice %217 {offsets = [0, 128], sizes = [8, 128], strides = [1, 1]} : vector<8x512xf32> to vector<8x128xf32>
    %225 = arith.negf %224 : vector<8x128xf32>
    %226 = math.exp %225 : vector<8x128xf32>
    %cst_50 = arith.constant 1.000000e+00 : f32
    %227 = vector.broadcast %cst_50 : f32 to vector<8x128xf32>
    %228 = arith.addf %227, %226 : vector<8x128xf32>
    %229 = arith.divf %227, %228 : vector<8x128xf32>
    %230 = vector.extract_strided_slice %217 {offsets = [0, 256], sizes = [8, 128], strides = [1, 1]} : vector<8x512xf32> to vector<8x128xf32>
    %231 = math.tanh %230 : vector<8x128xf32>
    %232 = vector.extract_strided_slice %217 {offsets = [0, 384], sizes = [8, 128], strides = [1, 1]} : vector<8x512xf32> to vector<8x128xf32>
    %233 = arith.negf %232 : vector<8x128xf32>
    %234 = math.exp %233 : vector<8x128xf32>
    %cst_51 = arith.constant 1.000000e+00 : f32
    %235 = vector.broadcast %cst_51 : f32 to vector<8x128xf32>
    %236 = arith.addf %235, %234 : vector<8x128xf32>
    %237 = arith.divf %235, %236 : vector<8x128xf32>
    %238 = arith.mulf %229, %211 : vector<8x128xf32>
    %239 = arith.mulf %223, %231 : vector<8x128xf32>
    %240 = arith.addf %238, %239 : vector<8x128xf32>
    %241 = math.tanh %240 : vector<8x128xf32>
    %242 = arith.mulf %237, %241 : vector<8x128xf32>
    %c56_52 = arith.constant 56 : index
    %c512 = arith.constant 512 : index
    %243 = vector.load %arg8[%c56_52, %c512] : memref<64x1024xf32, #tpu.memory_space<vmem>>, vector<8x512xf32>
    %244 = vector.extract_strided_slice %243 {offsets = [0, 0], sizes = [8, 128], strides = [1, 1]} : vector<8x512xf32> to vector<8x128xf32>
    %245 = arith.negf %244 : vector<8x128xf32>
    %246 = math.exp %245 : vector<8x128xf32>
    %cst_53 = arith.constant 1.000000e+00 : f32
    %247 = vector.broadcast %cst_53 : f32 to vector<8x128xf32>
    %248 = arith.addf %247, %246 : vector<8x128xf32>
    %249 = arith.divf %247, %248 : vector<8x128xf32>
    %250 = vector.extract_strided_slice %243 {offsets = [0, 256], sizes = [8, 128], strides = [1, 1]} : vector<8x512xf32> to vector<8x128xf32>
    %251 = math.tanh %250 : vector<8x128xf32>
    %252 = vector.extract_strided_slice %243 {offsets = [0, 384], sizes = [8, 128], strides = [1, 1]} : vector<8x512xf32> to vector<8x128xf32>
    %253 = arith.negf %252 : vector<8x128xf32>
    %254 = math.exp %253 : vector<8x128xf32>
    %cst_54 = arith.constant 1.000000e+00 : f32
    %255 = vector.broadcast %cst_54 : f32 to vector<8x128xf32>
    %256 = arith.addf %255, %254 : vector<8x128xf32>
    %257 = arith.divf %255, %256 : vector<8x128xf32>
    %258 = arith.mulf %249, %251 : vector<8x128xf32>
    %259 = math.tanh %258 : vector<8x128xf32>
    %260 = arith.mulf %257, %259 : vector<8x128xf32>
    %c0_55 = arith.constant 0 : index
    %c0_56 = arith.constant 0 : index
    %261 = vector.load %arg4[%c0_55, %c0_56] : memref<128x2xf32, #tpu.memory_space<vmem>>, vector<128x2xf32>
    %cst_57 = arith.constant dense<0.000000e+00> : vector<8x2xf32>
    %262 = tpu.matmul %242, %261, %cst_57 {dimension_numbers = #tpu.dot_dimension_numbers<[1], [0], [0], [1], [0, 0, 1, 1], [], []>} : vector<8x128xf32>, vector<128x2xf32>, vector<8x2xf32> -> vector<8x2xf32>
    %c0_58 = arith.constant 0 : index
    %c0_59 = arith.constant 0 : index
    %263 = vector.load %arg5[%c0_58, %c0_59] : memref<128x2xf32, #tpu.memory_space<vmem>>, vector<128x2xf32>
    %cst_60 = arith.constant dense<0.000000e+00> : vector<8x2xf32>
    %264 = tpu.matmul %260, %263, %cst_60 {dimension_numbers = #tpu.dot_dimension_numbers<[1], [0], [0], [1], [0, 0, 1, 1], [], []>} : vector<8x128xf32>, vector<128x2xf32>, vector<8x2xf32> -> vector<8x2xf32>
    %265 = arith.addf %262, %264 : vector<8x2xf32>
    %c0_61 = arith.constant 0 : index
    %c0_62 = arith.constant 0 : index
    %266 = vector.load %arg6[%c0_61, %c0_62] : memref<1x2xf32, #tpu.memory_space<vmem>>, vector<1x2xf32>
    %267 = vector.broadcast %266 : vector<1x2xf32> to vector<8x2xf32>
    %268 = arith.addf %265, %267 : vector<8x2xf32>
    %c0_63 = arith.constant 0 : index
    %c0_64 = arith.constant 0 : index
    %269 = vector.load %arg7[%c0_63, %c0_64] : memref<8x2xf32, #tpu.memory_space<vmem>>, vector<8x2xf32>
    tpu.vector_store %arg7[%c0_63, %c0_64], %268 {strides = array<i32>} : memref<8x2xf32, #tpu.memory_space<vmem>>, vector<8x2xf32>,
    return
  }
}

</mosaic_0001>

<bundles_post_ra>
// kernel: tpu_custom_call.1
= control target key start
LH: loop header
LB: loop body
LE: loop exit
PB: predicated region body
PF: predicated region fallthrough
CT: control target
= control target key end

     0   :  { %12 = vsyncpa [#allocation4], 0  ;;  %s2320_s24 = smov [#allocation3]   ;;  %s3349_s0 = inlined_call_operand.vmem [shape: f32[64,32], index: 0, kind: input, shape index: {}]   ;;  %s3350_s1 = inlined_call_operand.hbm [shape: bf16[32,1024], index: 1, kind: input, shape index: {}]   ;;  %s3351_s2 = inlined_call_operand.vmem [shape: f32[1,1024], index: 2, kind: input, shape index: {}]   ;;  %s3352_s3 = inlined_call_operand.vmem [shape: bf16[128,512], index: 3, kind: input, shape index: {}]   ;;  %s3353_s4 = inlined_call_operand.vmem [shape: f32[128,2], index: 4, kind: input, shape index: {}]   ;;  %s3354_s5 = inlined_call_operand.vmem [shape: f32[128,2], index: 5, kind: input, shape index: {}]   ;;  %s3355_s6 = inlined_call_operand.vmem [shape: f32[1,2], index: 6, kind: input, shape index: {}]   ;;  %s3356_s7 = inlined_call_operand.vmem [shape: f32[8,2], index: 7, kind: output, shape index: {}]  }
   0x1   :  { %s20_s25 = sshll.u32 %s2320_s24, 4  ;;  %s21_s25 = int_to_ptr.vmem [resolvable:$true] %s20_s25 }
   0x2   :  { %s2306_s26 = scalar_lea.vmem %s21_s25, 2048  ;;  %p2311_p1 = scmp.lt.s32.totalorder %s21_s25, %s21_s25 }
   0x3   :  { %p2307_p0 = scmp.ne.s32.totalorder %s21_s25, %s2306_s26  ;;  %p2312_p2 = scmp.lt.s32.totalorder %s2306_s26, %s2306_s26 }
   0x5   :  { %p2313_p3 = por %p2312_p2, %p2311_p1 }
   0x7   :  { %p2314_p4 = pnand %p2313_p3, %p2307_p0 }
   0x9   :  { %2317 = shalt.err (!%p2314_p4)
}
   0xa   :  { %s2321_s27 = smov 512   ;;  %s2322_s28 = smov 32  }
   0xb   :  { %26 = dma.hbm_to_vmem [thread:$0]  %s3350_s1, 2048, %s21_s25, [#allocation4], %s2321_s27, %s2321_s27, %s2322_s28  }
   0xc   :  { %2318 = dma.done.wait [#allocation4], 2048  }
   0xd   :  { %2319 = vsyncadd [#allocation4], 4294965248  ;;  %v3357_v0 = vmov 0   ;;  %v61_v1 = vld [vmem:[#allocation3 + $0x40] sm:$0xff]  ;;  %v62_v3 = vld [vmem:[#allocation3 + $0x48] sm:$0xff]  ;;  %vm191_vm0 = vcmask 261120  }
   0xe   :  { %236 = vmatprep.mubr.bf16.mxu0 %v3357_v0  ;;  %309 = vmatprep.mubr.bf16.mxu1 %v3357_v0  ;;  %v65_v2 = vld [vmem:[#allocation3 + $0x60] sm:$0xff]  ;;  %v66_v5 = vld [vmem:[#allocation3 + $0x68] sm:$0xff]  ;;  %v63_v15 = vld [vmem:[#allocation3 + $0x50] sm:$0xff]  ;;  %vm2325_vm1 = vmmov 0   ;;  %vm1870_vm2 = vcmask 15360  }
   0xf   :  { %v1886_v4 = vcombine.high %v61_v1, %v65_v2  ;;  %v1885_v6 = vcombine.low %v61_v1, %v65_v2  ;;  %v53_v7 = vld [vmem:[#allocation3] sm:$0xff]  ;;  %v1888_v9 = vcombine.high %v62_v3, %v66_v5  ;;  %v1887_v10 = vcombine.low %v62_v3, %v66_v5  ;;  %v54_v12 = vld [vmem:[#allocation3 + $0x8] sm:$0xff]  ;;  %v67_v16 = vld [vmem:[#allocation3 + $0x70] sm:$0xff] }
  0x10   :  { %v57_v8 = vld [vmem:[#allocation3 + $0x20] sm:$0xff]  ;;  %v58_v13 = vld [vmem:[#allocation3 + $0x28] sm:$0xff]  ;;  %v1890_v21 = vcombine.high %v63_v15, %v67_v16  ;;  %v64_v22 = vld [vmem:[#allocation3 + $0x58] sm:$0xff]  ;;  %v1889_v29 = vcombine.low %v63_v15, %v67_v16 }
  0x11   :  { %v1878_v11 = vcombine.high %v53_v7, %v57_v8  ;;  %216 = vmatprep.subr.bf16.mxu0 %v1886_v4  ;;  %v1880_v14 = vcombine.high %v54_v12, %v58_v13  ;;  %289 = vmatprep.subr.bf16.mxu1 %v1888_v9  ;;  %v1877_v17 = vcombine.low %v53_v7, %v57_v8  ;;  %v41_v18 = vld [vmem:[%s3349_s0] sm:$0xff]  ;;  %v42_v19 = vld [vmem:[%s3349_s0 + $0x8] sm:$0xff]  ;;  %v68_v23 = vld [vmem:[#allocation3 + $0x78] sm:$0xff] }
  0x12   :  { %217 = vmatpush1.bf16.msra.mxu0 %v1885_v6  ;;  %290 = vmatpush1.bf16.msra.mxu1 %v1887_v10  ;;  %v1879_v20 = vcombine.low %v54_v12, %v58_v13  ;;  %v49_v24 = vpack.c.bf16 %v42_v19, %v41_v18  ;;  %v55_v25 = vld [vmem:[#allocation3 + $0x10] sm:$0xff]  ;;  %v1892_v27 = vcombine.high %v64_v22, %v68_v23  ;;  %v56_v28 = vld [vmem:[#allocation3 + $0x18] sm:$0xff]  ;;  %v45_v41 = vld [vmem:[%s3349_s0 + $0x20] sm:$0xff] }
  0x13   :  { %218 = vmatprep.subr.bf16.mxu0 %v1878_v11  ;;  %291 = vmatprep.subr.bf16.mxu1 %v1880_v14  ;;  %v59_v26 = vld [vmem:[#allocation3 + $0x30] sm:$0xff]  ;;  %v60_v30 = vld [vmem:[#allocation3 + $0x38] sm:$0xff]  ;;  %v1891_v32 = vcombine.low %v64_v22, %v68_v23  ;;  %v46_v42 = vld [vmem:[%s3349_s0 + $0x28] sm:$0xff]  ;;  %v71_v14 = vlaneseq }
  0x14   :  { %v1882_v31 = vcombine.high %v55_v25, %v59_v26  ;;  %v1884_v33 = vcombine.high %v56_v28, %v60_v30  ;;  %v43_v34 = vld [vmem:[%s3349_s0 + $0x10] sm:$0xff]  ;;  %v44_v35 = vld [vmem:[%s3349_s0 + $0x18] sm:$0xff]  ;;  %v1881_v36 = vcombine.low %v55_v25, %v59_v26  ;;  %v1883_v38 = vcombine.low %v56_v28, %v60_v30  ;;  %v2670_v18 = vld [vmem:[%s3351_s2] sm:$0xff] }
  0x15   :  { %v2390_v37 = vld [vmem:[%s3352_s3 + $0xe4] ss:$16 sps:$4 sm:$0xff]   ;;  %v50_v39 = vpack.c.bf16 %v44_v35, %v43_v34  ;;  %v2395_v40 = vld [vmem:[%s3352_s3 + $0xec] ss:$16 sps:$4 sm:$0xff]   ;;  %v51_v43 = vpack.c.bf16 %v46_v42, %v45_v41  ;;  %v2430_v47 = vld [vmem:[%s3352_s3 + $0xe0] ss:$16 sps:$4 sm:$0xff]  }
  0x16   :  { %219 = vmatpush1.bf16.msra.mxu0 %v1877_v17  ;;  %292 = vmatpush1.bf16.msra.mxu1 %v1879_v20  ;;  %v47_v44 = vld [vmem:[%s3349_s0 + $0x30] sm:$0xff]  ;;  %v48_v45 = vld [vmem:[%s3349_s0 + $0x38] sm:$0xff]  ;;  %v2663_v15 = vshrl.u32 %v71_v14, 7 }
  0x17   :  { %362 = vmatprep.subr.bf16.mxu0 %v1890_v21  ;;  %435 = vmatprep.subr.bf16.mxu1 %v1892_v27  ;;  %v2419_v46 = vpack.c.bf16 %v48_v45, %v47_v44  ;;  %v2435_v48 = vld [vmem:[%s3352_s3 + $0xe8] ss:$16 sps:$4 sm:$0xff]   ;;  %v2440_v49 = vld [vmem:[%s3352_s3 + $0xc4] ss:$16 sps:$4 sm:$0xff]   ;;  %v2445_v50 = vld [vmem:[%s3352_s3 + $0xcc] ss:$16 sps:$4 sm:$0xff]  }
  0x18   :  { %v2453_v51 = vld [vmem:[%s3352_s3 + $0xc0] ss:$16 sps:$4 sm:$0xff]   ;;  %v2460_v52 = vld [vmem:[%s3352_s3 + $0xc8] ss:$16 sps:$4 sm:$0xff]   ;;  %v2465_v53 = vld [vmem:[%s3352_s3 + $0xa4] ss:$16 sps:$4 sm:$0xff]  }
  0x19   :  { %1893 = vmatmul.mubr.msk.bf16.vlgmr.msra.gmra.mxu0 %vm191_vm0, %v49_v24  ;;  %1897 = vmatmul.mubr.msk.bf16.vlgmr.msra.gmra.mxu1 %vm191_vm0, %v49_v24  ;;  %v2472_v54 = vld [vmem:[%s3352_s3 + $0xac] ss:$16 sps:$4 sm:$0xff]   ;;  %v2479_v55 = vld [vmem:[%s3352_s3 + $0xa0] ss:$16 sps:$4 sm:$0xff]   ;;  %v2486_v56 = vld [vmem:[%s3352_s3 + $0xa8] ss:$16 sps:$4 sm:$0xff]  }
  0x1a   :  { %363 = vmatpush1.bf16.msra.mxu0 %v1889_v29  ;;  %246 = vmatprep.mubr.bf16.mxu0 %v3357_v0  ;;  %v2491_v57 = vld [vmem:[%s3352_s3 + $0x84] ss:$16 sps:$4 sm:$0xff]   ;;  %v2497_v58 = vld [vmem:[%s3352_s3 + $0x8c] ss:$16 sps:$4 sm:$0xff]   ;;  %v2505_v59 = vld [vmem:[%s3352_s3 + $0x80] ss:$16 sps:$4 sm:$0xff]  }
  0x1b   :  { %319 = vmatprep.mubr.bf16.mxu1 %v3357_v0  ;;  %364 = vmatprep.subr.bf16.mxu0 %v1882_v31  ;;  %v2512_v60 = vld [vmem:[%s3352_s3 + $0x88] ss:$16 sps:$4 sm:$0xff]   ;;  %v2517_v61 = vld [vmem:[%s3352_s3 + $0x64] ss:$16 sps:$4 sm:$0xff]   ;;  %v2524_v62 = vld [vmem:[%s3352_s3 + $0x6c] ss:$16 sps:$4 sm:$0xff]  }
  0x1c   :  { %436 = vmatpush1.bf16.msra.mxu1 %v1891_v32  ;;  %v2531_v63 = vld [vmem:[%s3352_s3 + $0x60] ss:$16 sps:$4 sm:$0xff]   ;;  %v2538_v1 = vld [vmem:[%s3352_s3 + $0x68] ss:$16 sps:$4 sm:$0xff]   ;;  %v2543_v2 = vld [vmem:[%s3352_s3 + $0x44] ss:$16 sps:$4 sm:$0xff]  }
  0x1d   :  { %437 = vmatprep.subr.bf16.mxu1 %v1884_v33  ;;  %v2549_v3 = vld [vmem:[%s3352_s3 + $0x4c] ss:$16 sps:$4 sm:$0xff]   ;;  %v2557_v4 = vld [vmem:[%s3352_s3 + $0x40] ss:$16 sps:$4 sm:$0xff]   ;;  %v2564_v5 = vld [vmem:[%s3352_s3 + $0x48] ss:$16 sps:$4 sm:$0xff]  }
  0x1e   :  { %365 = vmatpush1.bf16.msra.mxu0 %v1881_v36  ;;  %v2569_v6 = vld [vmem:[%s3352_s3 + $0x24] ss:$16 sps:$4 sm:$0xff]   ;;  %v2576_v7 = vld [vmem:[%s3352_s3 + $0x2c] ss:$16 sps:$4 sm:$0xff]   ;;  %v2583_v8 = vld [vmem:[%s3352_s3 + $0x20] ss:$16 sps:$4 sm:$0xff]  }
  0x1f   :  { %756 = vmatprep.subr.bf16.mxu0 %v2390_v37  ;;  %v2590_v9 = vld [vmem:[%s3352_s3 + $0x28] ss:$16 sps:$4 sm:$0xff]   ;;  %v2595_v10 = vld [vmem:[%s3352_s3 + $0x4] ss:$16 sps:$4 sm:$0xff]   ;;  %v2601_v11 = vld [vmem:[%s3352_s3 + $0xc] ss:$16 sps:$4 sm:$0xff]  }
  0x20   :  { %438 = vmatpush1.bf16.msra.mxu1 %v1883_v38  ;;  %v2611_v12 = vld [vmem:[%s3352_s3] ss:$16 sps:$4 sm:$0xff]   ;;  %v2618_v13 = vld [vmem:[%s3352_s3 + $0x8] ss:$16 sps:$4 sm:$0xff]   ;;  %v81_v16 = vsub.s32 2, %v2663_v15  ;;  %v73_v17 = vsub.s32 0, %v2663_v15 }
  0x21   :  { %1894 = vmatmul.mubr.msk.bf16.gmra.mxu0 %vm191_vm0, %v50_v39  ;;  %797 = vmatprep.subr.bf16.mxu1 %v2395_v40  ;;  %v85_v20 = vsub.s32 3, %v2663_v15  ;;  %v77_v22 = vsub.s32 1, %v2663_v15 }
  0x22   :  { %1898 = vmatmul.mubr.msk.bf16.gmra.mxu1 %vm191_vm0, %v50_v39  ;;  %256 = vmatprep.mubr.bf16.mxu0 %v3357_v0  ;;  %v2679_v23 = vrot.slane %v2670_v18, %v81_v16  ;;  %v2684_v25 = vrot.slane %v2670_v18, %v73_v17 }
  0x23   :  { %329 = vmatprep.mubr.bf16.mxu1 %v3357_v0  ;;  %v2689_v27 = vrot.slane %v2670_v18, %v85_v20  ;;  %v2692_v29 = vrot.slane %v2670_v18, %v77_v22 }
  0x29   :  { %1895 = vmatmul.mubr.msk.bf16.gmra.mxu0 %vm191_vm0, %v51_v43 }
  0x2a   :  { %1899 = vmatmul.mubr.msk.bf16.gmra.mxu1 %vm191_vm0, %v51_v43  ;;  %266 = vmatprep.mubr.bf16.mxu0 %v3357_v0 }
  0x2b   :  { %339 = vmatprep.mubr.bf16.mxu1 %v3357_v0 }
  0x31   :  { %1896 = vmatmul.mubr.msk.bf16.gmra.mxu0 %vm191_vm0, %v2419_v46 }
  0x32   :  { %1900 = vmatmul.mubr.msk.bf16.gmra.mxu1 %vm191_vm0, %v2419_v46  ;;  %382 = vmatprep.mubr.bf16.mxu0 %v3357_v0 }
  0x33   :  { %455 = vmatprep.mubr.bf16.mxu1 %v3357_v0 }
  0x39   :  { %1901 = vmatmul.mubr.msk.bf16.vlgmr.msra.gmra.mxu0 %vm191_vm0, %v49_v24 }
  0x3a   :  { %1905 = vmatmul.mubr.msk.bf16.vlgmr.msra.gmra.mxu1 %vm191_vm0, %v49_v24  ;;  %757 = vmatpush1.bf16.msra.mxu0 %v2430_v47 }
  0x3b   :  { %798 = vmatpush1.bf16.msra.mxu1 %v2435_v48  ;;  %758 = vmatprep.subr.bf16.mxu0 %v2440_v49 }
  0x3c   :  { %799 = vmatprep.subr.bf16.mxu1 %v2445_v50  ;;  %392 = vmatprep.mubr.bf16.mxu0 %v3357_v0 }
  0x3d   :  { %465 = vmatprep.mubr.bf16.mxu1 %v3357_v0 }
  0x3e   :  { %759 = vmatpush1.bf16.msra.mxu0 %v2453_v51 }
  0x3f   :  { %800 = vmatpush1.bf16.msra.mxu1 %v2460_v52  ;;  %760 = vmatprep.subr.bf16.mxu0 %v2465_v53 }
  0x40   :  { %801 = vmatprep.subr.bf16.mxu1 %v2472_v54 }
  0x41   :  { %1902 = vmatmul.mubr.msk.bf16.gmra.mxu0 %vm191_vm0, %v50_v39 }
  0x42   :  { %1906 = vmatmul.mubr.msk.bf16.gmra.mxu1 %vm191_vm0, %v50_v39  ;;  %761 = vmatpush1.bf16.msra.mxu0 %v2479_v55 }
  0x43   :  { %802 = vmatpush1.bf16.msra.mxu1 %v2486_v56  ;;  %762 = vmatprep.subr.bf16.mxu0 %v2491_v57 }
  0x44   :  { %803 = vmatprep.subr.bf16.mxu1 %v2497_v58  ;;  %402 = vmatprep.mubr.bf16.mxu0 %v3357_v0 }
  0x45   :  { %475 = vmatprep.mubr.bf16.mxu1 %v3357_v0 }
  0x46   :  { %763 = vmatpush1.bf16.msra.mxu0 %v2505_v59 }
  0x47   :  { %804 = vmatpush1.bf16.msra.mxu1 %v2512_v60  ;;  %764 = vmatprep.subr.bf16.mxu0 %v2517_v61 }
  0x48   :  { %805 = vmatprep.subr.bf16.mxu1 %v2524_v62 }
  0x49   :  { %1903 = vmatmul.mubr.msk.bf16.gmra.mxu0 %vm191_vm0, %v51_v43 }
  0x4a   :  { %1907 = vmatmul.mubr.msk.bf16.gmra.mxu1 %vm191_vm0, %v51_v43  ;;  %765 = vmatpush1.bf16.msra.mxu0 %v2531_v63 }
  0x4b   :  { %806 = vmatpush1.bf16.msra.mxu1 %v2538_v1  ;;  %766 = vmatprep.subr.bf16.mxu0 %v2543_v2 }
  0x4c   :  { %807 = vmatprep.subr.bf16.mxu1 %v2549_v3  ;;  %412 = vmatprep.mubr.bf16.mxu0 %v3357_v0 }
  0x4d   :  { %485 = vmatprep.mubr.bf16.mxu1 %v3357_v0 }
  0x4e   :  { %767 = vmatpush1.bf16.msra.mxu0 %v2557_v4 }
  0x4f   :  { %808 = vmatpush1.bf16.msra.mxu1 %v2564_v5  ;;  %768 = vmatprep.subr.bf16.mxu0 %v2569_v6 }
  0x50   :  { %809 = vmatprep.subr.bf16.mxu1 %v2576_v7 }
  0x51   :  { %1904 = vmatmul.mubr.msk.bf16.gmra.mxu0 %vm191_vm0, %v2419_v46 }
  0x52   :  { %1908 = vmatmul.mubr.msk.bf16.gmra.mxu1 %vm191_vm0, %v2419_v46  ;;  %769 = vmatpush1.bf16.msra.mxu0 %v2583_v8 }
  0x53   :  { %810 = vmatpush1.bf16.msra.mxu1 %v2590_v9  ;;  %770 = vmatprep.subr.bf16.mxu0 %v2595_v10 }
  0x54   :  { %811 = vmatprep.subr.bf16.mxu1 %v2601_v11  ;;  %788 = vmatprep.mubr.bf16.mxu0 %v3357_v0 }
  0x55   :  { %829 = vmatprep.mubr.bf16.mxu1 %v3357_v0 }
  0x56   :  { %771 = vmatpush1.bf16.msra.mxu0 %v2611_v12 }
  0x57   :  { %812 = vmatpush1.bf16.msra.mxu1 %v2618_v13  ;;  %871 = vmatprep.subr.bf16.mxu0 %v2390_v37 }
  0x58   :  { %912 = vmatprep.subr.bf16.mxu1 %v2395_v40 }
  0x59   :  { %789 = vmatmul.mubr.bf16.vlgmr.msra.gmra.mxu0 %v3357_v0 }
  0x5a   :  { %830 = vmatmul.mubr.bf16.vlgmr.msra.gmra.mxu1 %v3357_v0  ;;  %872 = vmatpush1.bf16.msra.mxu0 %v2430_v47 }
  0x5b   :  { %913 = vmatpush1.bf16.msra.mxu1 %v2435_v48  ;;  %873 = vmatprep.subr.bf16.mxu0 %v2440_v49 }
  0x5c   :  { %914 = vmatprep.subr.bf16.mxu1 %v2445_v50  ;;  %903 = vmatprep.mubr.bf16.mxu0 %v3357_v0 }
  0x5d   :  { %944 = vmatprep.mubr.bf16.mxu1 %v3357_v0 }
  0x5e   :  { %874 = vmatpush1.bf16.msra.mxu0 %v2453_v51 }
  0x5f   :  { %915 = vmatpush1.bf16.msra.mxu1 %v2460_v52  ;;  %875 = vmatprep.subr.bf16.mxu0 %v2465_v53 }
  0x60   :  { %916 = vmatprep.subr.bf16.mxu1 %v2472_v54 }
  0x62   :  { %876 = vmatpush1.bf16.msra.mxu0 %v2479_v55 }
  0x63   :  { %917 = vmatpush1.bf16.msra.mxu1 %v2486_v56  ;;  %877 = vmatprep.subr.bf16.mxu0 %v2491_v57 }
  0x64   :  { %918 = vmatprep.subr.bf16.mxu1 %v2497_v58 }
  0x66   :  { %878 = vmatpush1.bf16.msra.mxu0 %v2505_v59 }
  0x67   :  { %919 = vmatpush1.bf16.msra.mxu1 %v2512_v60  ;;  %879 = vmatprep.subr.bf16.mxu0 %v2517_v61 }
  0x68   :  { %920 = vmatprep.subr.bf16.mxu1 %v2524_v62 }
  0x6a   :  { %880 = vmatpush1.bf16.msra.mxu0 %v2531_v63 }
  0x6b   :  { %921 = vmatpush1.bf16.msra.mxu1 %v2538_v1  ;;  %881 = vmatprep.subr.bf16.mxu0 %v2543_v2 }
  0x6c   :  { %922 = vmatprep.subr.bf16.mxu1 %v2549_v3 }
  0x6e   :  { %882 = vmatpush1.bf16.msra.mxu0 %v2557_v4 }
  0x6f   :  { %923 = vmatpush1.bf16.msra.mxu1 %v2564_v5  ;;  %883 = vmatprep.subr.bf16.mxu0 %v2569_v6 }
  0x70   :  { %924 = vmatprep.subr.bf16.mxu1 %v2576_v7 }
  0x72   :  { %884 = vmatpush1.bf16.msra.mxu0 %v2583_v8 }
  0x73   :  { %925 = vmatpush1.bf16.msra.mxu1 %v2590_v9  ;;  %885 = vmatprep.subr.bf16.mxu0 %v2595_v10 }
  0x74   :  { %926 = vmatprep.subr.bf16.mxu1 %v2601_v11 }
  0x76   :  { %886 = vmatpush1.bf16.msra.mxu0 %v2611_v12 }
  0x77   :  { %927 = vmatpush1.bf16.msra.mxu1 %v2618_v13  ;;  %986 = vmatprep.subr.bf16.mxu0 %v2390_v37 }
  0x78   :  { %1027 = vmatprep.subr.bf16.mxu1 %v2395_v40 }
  0xd9   :  { %v2672_v19 = vpop.f32.mrf.mxu0  ;;  %v2675_v21 = vpop.f32.mrf.mxu1 }
  0xdb   :  { %v2681_v24 = vpop.f32.mrf.mxu0  ;;  %v2686_v26 = vpop.f32.mrf.mxu1 }
  0xdd   :  { %v242_v28 = vpop.f32.mrf.mxu0  ;;  %v315_v31 = vpop.f32.mrf.mxu1 }
  0xde   :  { %v2695_v30 = vadd.f32 %v242_v28, %v2684_v25  ;;  %v2698_v32 = vadd.f32 %v315_v31, %v2679_v23 }
  0xdf   :  { %v244_v33 = vpop.f32.mrf.mxu0  ;;  %v317_v35 = vpop.f32.mrf.mxu1 }
  0xe0   :  { %3359 = vst [vmem:[#allocation6_spill] sm:$0xff] %v2698_v32  ;;  %v2701_v34 = vadd.f32 %v244_v33, %v2692_v29  ;;  %v2704_v36 = vadd.f32 %v317_v35, %v2689_v27 }
  0xe1   :  { %v248_v38 = vpop.f32.mrf.mxu0 }
  0xe2   :  { %3360 = vst [vmem:[#allocation7_spill] sm:$0xff] %v2704_v36  ;;  %v2707_v39 = vadd.f32 %v248_v38, %v2684_v25  ;;  %v321_v41 = vpop.f32.mrf.mxu1 }
  0xe3   :  { %v2710_v42 = vadd.f32 %v321_v41, %v2679_v23  ;;  %v250_v43 = vpop.f32.mrf.mxu0 }
  0xe4   :  { %3361 = vst [vmem:[#allocation8_spill] sm:$0xff] %v2707_v39  ;;  %v2713_v44 = vadd.f32 %v250_v43, %v2692_v29  ;;  %v323_v45 = vpop.f32.mrf.mxu1 }
  0xe5   :  { %3362 = vst [vmem:[#allocation9_spill] sm:$0xff] %v2710_v42  ;;  %v2716_v46 = vadd.f32 %v323_v45, %v2689_v27  ;;  %v252_v14 = vpop.f32.mrf.mxu0 }
  0xe6   :  { %3363 = vst [vmem:[#allocation10_spill] sm:$0xff] %v2713_v44  ;;  %v2719_v16 = vadd.f32 %v252_v14, %v2684_v25  ;;  %v325_v17 = vpop.f32.mrf.mxu1 }
  0xe7   :  { %3364 = vst [vmem:[#allocation11_spill] sm:$0xff] %v2716_v46  ;;  %v2722_v20 = vadd.f32 %v325_v17, %v2679_v23  ;;  %v254_v22 = vpop.f32.mrf.mxu0 }
  0xe8   :  { %3365 = vst [vmem:[#allocation12_spill] sm:$0xff] %v2719_v16  ;;  %v2725_v28 = vadd.f32 %v254_v22, %v2692_v29  ;;  %v327_v31 = vpop.f32.mrf.mxu1 }
  0xe9   :  { %3366 = vst [vmem:[#allocation13_spill] sm:$0xff] %v2722_v20  ;;  %v2728_v33 = vadd.f32 %v327_v31, %v2689_v27  ;;  %v258_v35 = vpop.f32.mrf.mxu0 }
  0xea   :  { %3367 = vst [vmem:[#allocation14_spill] sm:$0xff] %v2725_v28  ;;  %v2731_v38 = vadd.f32 %v258_v35, %v2684_v25  ;;  %v331_v41 = vpop.f32.mrf.mxu1 }
  0xeb   :  { %3368 = vst [vmem:[#allocation15_spill] sm:$0xff] %v2728_v33  ;;  %v2734_v43 = vadd.f32 %v331_v41, %v2679_v23  ;;  %v260_v45 = vpop.f32.mrf.mxu0 }
  0xec   :  { %3369 = vst [vmem:[#allocation16_spill] sm:$0xff] %v2731_v38  ;;  %v2737_v14 = vadd.f32 %v260_v45, %v2692_v29  ;;  %v333_v17 = vpop.f32.mrf.mxu1 }
  0xed   :  { %3370 = vst [vmem:[#allocation17_spill] sm:$0xff] %v2734_v43  ;;  %v2740_v22 = vadd.f32 %v333_v17, %v2689_v27  ;;  %v262_v0 = vpop.f32.mrf.mxu0 }
  0xee   :  { %3371 = vst [vmem:[#allocation18_spill] sm:$0xff] %v2737_v14  ;;  %v2743_v31 = vadd.f32 %v262_v0, %v2684_v25  ;;  %v335_v20 = vpop.f32.mrf.mxu1 }
  0xef   :  { %3372 = vst [vmem:[#allocation19_spill] sm:$0xff] %v2740_v22  ;;  %v2746_v35 = vadd.f32 %v335_v20, %v2679_v23  ;;  %v264_v38 = vpop.f32.mrf.mxu0 }
  0xf0   :  { %3373 = vst [vmem:[#allocation20_spill] sm:$0xff] %v2743_v31  ;;  %v2749_v41 = vadd.f32 %v264_v38, %v2692_v29  ;;  %v337_v43 = vpop.f32.mrf.mxu1 }
  0xf1   :  { %3374 = vst [vmem:[#allocation21_spill] sm:$0xff] %v2746_v35  ;;  %v2752_v45 = vadd.f32 %v337_v43, %v2689_v27  ;;  %v268_v14 = vpop.f32.mrf.mxu0 }
  0xf2   :  { %3375 = vst [vmem:[#allocation22_spill] sm:$0xff] %v2749_v41  ;;  %v2755_v17 = vadd.f32 %v268_v14, %v2684_v25  ;;  %v341_v22 = vpop.f32.mrf.mxu1 }
  0xf3   :  { %3376 = vst [vmem:[#allocation23_spill] sm:$0xff] %v2752_v45  ;;  %v2758_v0 = vadd.f32 %v341_v22, %v2679_v23  ;;  %v270_v31 = vpop.f32.mrf.mxu0 }
  0xf4   :  { %3377 = vst [vmem:[#allocation24_spill] sm:$0xff] %v2755_v17  ;;  %v2761_v20 = vadd.f32 %v270_v31, %v2692_v29  ;;  %v343_v35 = vpop.f32.mrf.mxu1 }
  0xf5   :  { %3378 = vst [vmem:[#allocation25_spill] sm:$0xff] %v2758_v0  ;;  %v2764_v38 = vadd.f32 %v343_v35, %v2689_v27  ;;  %v272_v41 = vpop.f32.mrf.mxu0 }
  0xf6   :  { %3379 = vst [vmem:[#allocation26_spill] sm:$0xff] %v2761_v20  ;;  %v2767_v43 = vadd.f32 %v272_v41, %v2684_v25  ;;  %v345_v45 = vpop.f32.mrf.mxu1 }
  0xf7   :  { %3380 = vst [vmem:[#allocation27_spill] sm:$0xff] %v2764_v38  ;;  %v2770_v14 = vadd.f32 %v345_v45, %v2679_v23  ;;  %v274_v17 = vpop.f32.mrf.mxu0 }
  0xf8   :  { %3381 = vst [vmem:[#allocation28_spill] sm:$0xff] %v2767_v43  ;;  %v2773_v22 = vadd.f32 %v274_v17, %v2692_v29  ;;  %v347_v0 = vpop.f32.mrf.mxu1 }
  0xf9   :  { %3382 = vst [vmem:[#allocation29_spill] sm:$0xff] %v2770_v14  ;;  %v2776_v31 = vadd.f32 %v347_v0, %v2689_v27  ;;  %v384_v20 = vpop.f32.mrf.mxu0 }
  0xfa   :  { %3383 = vst [vmem:[#allocation30_spill] sm:$0xff] %v2773_v22  ;;  %v457_v33 = vpop.f32.mrf.mxu1 }
  0xfb   :  { %3384 = vst [vmem:[#allocation31_spill] sm:$0xff] %v2776_v31  ;;  %v386_v35 = vpop.f32.mrf.mxu0 }
  0xfc   :  { %v459_v38 = vpop.f32.mrf.mxu1 }
  0xfd   :  { %v388_v28 = vpop.f32.mrf.mxu0  ;;  %v89_v38 = vsub.s32 4, %v2663_v15 }
  0xfe   :  { %v461_v16 = vpop.f32.mrf.mxu1 }
  0xff   :  { %v390_v41 = vpop.f32.mrf.mxu0 }
 0x100   :  { %v463_v43 = vpop.f32.mrf.mxu1 }
 0x101   :  { %v394_v42 = vpop.f32.mrf.mxu0 }
 0x102   :  { %v467_v46 = vpop.f32.mrf.mxu1  ;;  %v90_v42 = vrot.slane %v2670_v18, %v89_v38 }
 0x103   :  { %v396_v45 = vpop.f32.mrf.mxu0 }
 0x104   :  { %v469_v14 = vpop.f32.mrf.mxu1 }
 0x105   :  { %v398_v44 = vpop.f32.mrf.mxu0 }
 0x106   :  { %v471_v39 = vpop.f32.mrf.mxu1 }
 0x107   :  { %v400_v17 = vpop.f32.mrf.mxu0  ;;  %v101_v39 = vsub.s32 7, %v2663_v15 }
 0x108   :  { %v473_v22 = vpop.f32.mrf.mxu1 }
 0x109   :  { %v404_v32 = vpop.f32.mrf.mxu0  ;;  %v102_v17 = vrot.slane %v2670_v18, %v101_v39 }
 0x10a   :  { %v477_v36 = vpop.f32.mrf.mxu1 }
 0x10b   :  { %v406_v0 = vpop.f32.mrf.mxu0 }
 0x10c   :  { %v479_v31 = vpop.f32.mrf.mxu1 }
 0x10d   :  { %v408_v20 = vpop.f32.mrf.mxu0  ;;  %v239_v31 = vadd.f32 %v2672_v19, %v2684_v25 }
 0x10e   :  { %v481_v33 = vpop.f32.mrf.mxu1  ;;  %v241_v20 = vadd.f32 %v2681_v24, %v2692_v29  ;;  %v314_v29 = vadd.f32 %v2686_v26, %v2689_v27 }
 0x10f   :  { %v410_v28 = vpop.f32.mrf.mxu0 }
 0x110   :  { %v483_v16 = vpop.f32.mrf.mxu1 }
 0x111   :  { %v414_v35 = vpop.f32.mrf.mxu0 }
 0x112   :  { %v487_v43 = vpop.f32.mrf.mxu1 }
 0x113   :  { %v416_v46 = vpop.f32.mrf.mxu0 }
 0x114   :  { %v489_v14 = vpop.f32.mrf.mxu1 }
 0x115   :  { %v418_v44 = vpop.f32.mrf.mxu0 }
 0x116   :  { %v419_v22 = vadd.f32 %v418_v44, %v90_v42  ;;  %v491_v32 = vpop.f32.mrf.mxu1  ;;  %v97_v42 = vsub.s32 6, %v2663_v15  ;;  %v312_v15 = vadd.f32 %v2675_v21, %v2679_v23 }
 0x117   :  { %v420_v36 = vpop.f32.mrf.mxu0 }
 0x118   :  { %v1965_v41 = vmul.f32 -1.442695, %v419_v22  ;;  %v493_v45 = vpop.f32.mrf.mxu1  ;;  %v98_v22 = vrot.slane %v2670_v18, %v97_v42 }
 0x119   :  { %v790_v0 = vpop.f32.mrf.mxu0  ;;  %v494_v46 = vadd.f32 %v493_v45, %v102_v17 }
 0x11a   :  { %2126 = vpow2.f32 %v1965_v41  ;;  %v838_v33 = vadd.f32 %v790_v0, %v239_v31  ;;  %v831_v38 = vpop.f32.mrf.mxu1  ;;  %v492_v36 = vadd.f32 %v491_v32, %v98_v22 }
 0x11b   :  { %v792_v28 = vpop.f32.mrf.mxu0  ;;  %v1966_v24 = vmul.f32 -1.442695, %v494_v46  ;;  %v840_v17 = vadd.f32 %v831_v38, %v312_v15 }
 0x11c   :  { %v1941_v16 = vmul.f32 -1.442695, %v838_v33  ;;  %v839_v35 = vadd.f32 %v792_v28, %v241_v20  ;;  %v833_v43 = vpop.f32.mrf.mxu1 }
 0x11d   :  { %v794_v14 = vpop.f32.mrf.mxu0  ;;  %v841_v31 = vadd.f32 %v833_v43, %v314_v29 }
 0x11e   :  { %2128 = vpow2.f32 %v1941_v16  ;;  %v1942_v19 = vmul.f32 -1.442695, %v839_v35  ;;  %v835_v25 = vpop.f32.mrf.mxu1 }
 0x11f   :  { %v795_v44 = vpop.f32.mrf.mxu0  ;;  %v1943_v0 = vmul.f32 -1.442695, %v841_v31  ;;  %v3385_v31 = vmov 0  }
 0x120   :  { %2130 = vpow2.f32 %v1942_v19  ;;  %v836_v39 = vpop.f32.mrf.mxu1 }
 0x121   :  { %2132 = vpow2.f32 %v1966_v24 }
 0x122   :  { %2134 = vtanh.f32 %v492_v36 }
 0x127   :  { %v2127_v41 = vpop.eup %2126 }
 0x128   :  { %v1677_v45 = vadd.f32 1.0, %v2127_v41 }
 0x12a   :  { %2136 = vrcp.f32 %v1677_v45 }
 0x12b   :  { %v2129_v20 = vpop.eup %2128  ;;  %2138 = vtanh.f32 %v840_v17 }
 0x12c   :  { %v845_v33 = vadd.f32 1.0, %v2129_v20  ;;  %2140 = vpow2.f32 %v1943_v0 }
 0x12d   :  { %v2131_v18 = vpop.eup %2130 }
 0x12e   :  { %2142 = vrcp.f32 %v845_v33  ;;  %v851_v28 = vadd.f32 1.0, %v2131_v18  ;;  %v2133_v26 = vpop.eup %2132 }
 0x12f   :  { %v1684_v27 = vadd.f32 1.0, %v2133_v26  ;;  %v2135_v32 = vpop.eup %2134 }
 0x130   :  { %2144 = vrcp.f32 %v851_v28 }
 0x131   :  { %2146 = vrcp.f32 %v1684_v27 }
 0x137   :  { %v2137_v16 = vpop.eup %2136 }
 0x138   :  { %v1687_v35 = vmul.f32 %v2137_v16, %v2135_v32  ;;  %v2139_v21 = vpop.eup %2138  ;;  %v3386_v16 = vld [vmem:[#allocation7_spill] sm:$0xff] }
 0x139   :  { %v2141_v23 = vpop.eup %2140 }
 0x13a   :  { %2148 = vtanh.f32 %v1687_v35  ;;  %v858_v46 = vadd.f32 1.0, %v2141_v23 }
 0x13b   :  { %v2143_v38 = vpop.eup %2142 }
 0x13c   :  { %v862_v43 = vmul.f32 %v2143_v38, %v2139_v21  ;;  %2150 = vrcp.f32 %v858_v46  ;;  %v3387_v21 = vld [vmem:[#allocation6_spill] sm:$0xff] }
 0x13d   :  { %v2145_v42 = vpop.eup %2144 }
 0x13e   :  { %v861_v14 = vmul.f32 0.0, %v2145_v42  ;;  %v2147_v25 = vpop.eup %2146 }
 0x140   :  { %v2792_v19 = vadd.f32 %v862_v43, %v861_v14 }
 0x142   :  { %2152 = vtanh.f32 %v2792_v19 }
 0x147   :  { %v2149_v44 = vpop.eup %2148 }
 0x148   :  { %v2795_v39 = vmul.f32 %v2149_v44, %v2147_v25 }
 0x149   :  { %v2151_v22 = vpop.eup %2150 }
 0x14f   :  { %v2153_v24 = vpop.eup %2152 }
 0x150   :  { %v865_v29 = vmul.f32 %v2153_v24, %v2151_v22 }
 0x152   :  { %v870_v36 = vpack.c.bf16 %v865_v29, %v865_v29 }
 0x154   :  { %904 = vmatmul.mubr.bf16.vlgmr.msra.gmra.mxu0 %v870_v36  ;;  %945 = vmatmul.mubr.bf16.vlgmr.msra.gmra.mxu1 %v870_v36 }
 0x155   :  { %987 = vmatpush1.bf16.msra.mxu0 %v2430_v47  ;;  %1028 = vmatpush1.bf16.msra.mxu1 %v2435_v48 }
 0x156   :  { %988 = vmatprep.subr.bf16.mxu0 %v2440_v49  ;;  %1029 = vmatprep.subr.bf16.mxu1 %v2445_v50 }
 0x157   :  { %1018 = vmatprep.mubr.bf16.mxu0 %v3385_v31  ;;  %1059 = vmatprep.mubr.bf16.mxu1 %v3385_v31 }
 0x159   :  { %989 = vmatpush1.bf16.msra.mxu0 %v2453_v51  ;;  %1030 = vmatpush1.bf16.msra.mxu1 %v2460_v52 }
 0x15a   :  { %990 = vmatprep.subr.bf16.mxu0 %v2465_v53  ;;  %1031 = vmatprep.subr.bf16.mxu1 %v2472_v54 }
 0x15d   :  { %991 = vmatpush1.bf16.msra.mxu0 %v2479_v55  ;;  %1032 = vmatpush1.bf16.msra.mxu1 %v2486_v56 }
 0x15e   :  { %992 = vmatprep.subr.bf16.mxu0 %v2491_v57  ;;  %1033 = vmatprep.subr.bf16.mxu1 %v2497_v58 }
 0x161   :  { %993 = vmatpush1.bf16.msra.mxu0 %v2505_v59  ;;  %1034 = vmatpush1.bf16.msra.mxu1 %v2512_v60 }
 0x162   :  { %994 = vmatprep.subr.bf16.mxu0 %v2517_v61  ;;  %1035 = vmatprep.subr.bf16.mxu1 %v2524_v62 }
 0x165   :  { %995 = vmatpush1.bf16.msra.mxu0 %v2531_v63  ;;  %1036 = vmatpush1.bf16.msra.mxu1 %v2538_v1 }
 0x166   :  { %996 = vmatprep.subr.bf16.mxu0 %v2543_v2  ;;  %1037 = vmatprep.subr.bf16.mxu1 %v2549_v3 }
 0x169   :  { %997 = vmatpush1.bf16.msra.mxu0 %v2557_v4  ;;  %1038 = vmatpush1.bf16.msra.mxu1 %v2564_v5 }
 0x16a   :  { %998 = vmatprep.subr.bf16.mxu0 %v2569_v6  ;;  %1039 = vmatprep.subr.bf16.mxu1 %v2576_v7 }
 0x16d   :  { %999 = vmatpush1.bf16.msra.mxu0 %v2583_v8  ;;  %1040 = vmatpush1.bf16.msra.mxu1 %v2590_v9 }
 0x16e   :  { %1000 = vmatprep.subr.bf16.mxu0 %v2595_v10  ;;  %1041 = vmatprep.subr.bf16.mxu1 %v2601_v11 }
 0x171   :  { %1001 = vmatpush1.bf16.msra.mxu0 %v2611_v12  ;;  %1042 = vmatpush1.bf16.msra.mxu1 %v2618_v13 }
 0x172   :  { %1101 = vmatprep.subr.bf16.mxu0 %v2390_v37  ;;  %1142 = vmatprep.subr.bf16.mxu1 %v2395_v40 }
 0x214   :  { %v905_v15 = vpop.f32.mrf.mxu0  ;;  %v946_v41 = vpop.f32.mrf.mxu1 }
 0x215   :  { %v953_v45 = vadd.f32 %v905_v15, %v2695_v30  ;;  %v955_v23 = vadd.f32 %v946_v41, %v3387_v21 }
 0x216   :  { %v907_v17 = vpop.f32.mrf.mxu0  ;;  %v948_v0 = vpop.f32.mrf.mxu1 }
 0x217   :  { %v1944_v20 = vmul.f32 -1.442695, %v953_v45  ;;  %v954_v33 = vadd.f32 %v907_v17, %v2701_v34  ;;  %v956_v35 = vadd.f32 %v948_v0, %v3386_v16 }
 0x218   :  { %v909_v18 = vpop.f32.mrf.mxu0  ;;  %v950_v28 = vpop.f32.mrf.mxu1 }
 0x219   :  { %2154 = vpow2.f32 %v1944_v20  ;;  %v1945_v26 = vmul.f32 -1.442695, %v954_v33  ;;  %v1946_v38 = vmul.f32 -1.442695, %v956_v35  ;;  %v3388_v20 = vld [vmem:[#allocation8_spill] sm:$0xff] }
 0x21a   :  { %v910_v27 = vpop.f32.mrf.mxu0  ;;  %v951_v32 = vpop.f32.mrf.mxu1 }
 0x21b   :  { %2156 = vpow2.f32 %v1945_v26  ;;  %v3389_v27 = vld [vmem:[#allocation10_spill] sm:$0xff] }
 0x21c   :  { %2158 = vtanh.f32 %v955_v23 }
 0x21d   :  { %2160 = vpow2.f32 %v1946_v38 }
 0x226   :  { %v2155_v43 = vpop.eup %2154 }
 0x227   :  { %v960_v42 = vadd.f32 1.0, %v2155_v43  ;;  %v3390_v43 = vld [vmem:[#allocation11_spill] sm:$0xff] }
 0x228   :  { %v2157_v30 = vpop.eup %2156 }
 0x229   :  { %2162 = vrcp.f32 %v960_v42  ;;  %v966_v46 = vadd.f32 1.0, %v2157_v30  ;;  %v2159_v34 = vpop.eup %2158  ;;  %v3391_v42 = vld [vmem:[#allocation9_spill] sm:$0xff] }
 0x22a   :  { %v2161_v14 = vpop.eup %2160 }
 0x22b   :  { %2164 = vrcp.f32 %v966_v46  ;;  %v973_v24 = vadd.f32 1.0, %v2161_v14 }
 0x22d   :  { %2166 = vrcp.f32 %v973_v24 }
 0x236   :  { %v2163_v25 = vpop.eup %2162 }
 0x237   :  { %v977_v44 = vmul.f32 %v2163_v25, %v2159_v34 }
 0x238   :  { %v2165_v22 = vpop.eup %2164 }
 0x239   :  { %v976_v29 = vmul.f32 %v2165_v22, %v2792_v19 }
 0x23a   :  { %v2167_v15 = vpop.eup %2166 }
 0x23b   :  { %v2836_v36 = vadd.f32 %v977_v44, %v976_v29 }
 0x23d   :  { %2168 = vtanh.f32 %v2836_v36 }
 0x24a   :  { %v2169_v41 = vpop.eup %2168 }
 0x24b   :  { %v980_v45 = vmul.f32 %v2169_v41, %v2167_v15 }
 0x24d   :  { %v985_v17 = vpack.c.bf16 %v980_v45, %v980_v45 }
 0x24f   :  { %1019 = vmatmul.mubr.bf16.vlgmr.msra.gmra.mxu0 %v985_v17  ;;  %1060 = vmatmul.mubr.bf16.vlgmr.msra.gmra.mxu1 %v985_v17 }
 0x250   :  { %1102 = vmatpush1.bf16.msra.mxu0 %v2430_v47  ;;  %1143 = vmatpush1.bf16.msra.mxu1 %v2435_v48 }
 0x251   :  { %1103 = vmatprep.subr.bf16.mxu0 %v2440_v49  ;;  %1144 = vmatprep.subr.bf16.mxu1 %v2445_v50 }
 0x252   :  { %1133 = vmatprep.mubr.bf16.mxu0 %v3385_v31  ;;  %1174 = vmatprep.mubr.bf16.mxu1 %v3385_v31 }
 0x254   :  { %1104 = vmatpush1.bf16.msra.mxu0 %v2453_v51  ;;  %1145 = vmatpush1.bf16.msra.mxu1 %v2460_v52 }
 0x255   :  { %1105 = vmatprep.subr.bf16.mxu0 %v2465_v53  ;;  %1146 = vmatprep.subr.bf16.mxu1 %v2472_v54 }
 0x258   :  { %1106 = vmatpush1.bf16.msra.mxu0 %v2479_v55  ;;  %1147 = vmatpush1.bf16.msra.mxu1 %v2486_v56 }
 0x259   :  { %1107 = vmatprep.subr.bf16.mxu0 %v2491_v57  ;;  %1148 = vmatprep.subr.bf16.mxu1 %v2497_v58 }
 0x25c   :  { %1108 = vmatpush1.bf16.msra.mxu0 %v2505_v59  ;;  %1149 = vmatpush1.bf16.msra.mxu1 %v2512_v60 }
 0x25d   :  { %1109 = vmatprep.subr.bf16.mxu0 %v2517_v61  ;;  %1150 = vmatprep.subr.bf16.mxu1 %v2524_v62 }
 0x260   :  { %1110 = vmatpush1.bf16.msra.mxu0 %v2531_v63  ;;  %1151 = vmatpush1.bf16.msra.mxu1 %v2538_v1 }
 0x261   :  { %1111 = vmatprep.subr.bf16.mxu0 %v2543_v2  ;;  %1152 = vmatprep.subr.bf16.mxu1 %v2549_v3 }
 0x264   :  { %1112 = vmatpush1.bf16.msra.mxu0 %v2557_v4  ;;  %1153 = vmatpush1.bf16.msra.mxu1 %v2564_v5 }
 0x265   :  { %1113 = vmatprep.subr.bf16.mxu0 %v2569_v6  ;;  %1154 = vmatprep.subr.bf16.mxu1 %v2576_v7 }
 0x268   :  { %1114 = vmatpush1.bf16.msra.mxu0 %v2583_v8  ;;  %1155 = vmatpush1.bf16.msra.mxu1 %v2590_v9 }
 0x269   :  { %1115 = vmatprep.subr.bf16.mxu0 %v2595_v10  ;;  %1156 = vmatprep.subr.bf16.mxu1 %v2601_v11 }
 0x26c   :  { %1116 = vmatpush1.bf16.msra.mxu0 %v2611_v12  ;;  %1157 = vmatpush1.bf16.msra.mxu1 %v2618_v13 }
 0x26d   :  { %1216 = vmatprep.subr.bf16.mxu0 %v2390_v37  ;;  %1257 = vmatprep.subr.bf16.mxu1 %v2395_v40 }
 0x30f   :  { %v1020_v19 = vpop.f32.mrf.mxu0  ;;  %v1061_v0 = vpop.f32.mrf.mxu1 }
 0x310   :  { %v1068_v33 = vadd.f32 %v1020_v19, %v3388_v20  ;;  %v1070_v40 = vadd.f32 %v1061_v0, %v3391_v42  ;;  %v3395_v42 = vld [vmem:[#allocation13_spill] sm:$0xff] }
 0x311   :  { %v1022_v18 = vpop.f32.mrf.mxu0  ;;  %v1063_v28 = vpop.f32.mrf.mxu1 }
 0x312   :  { %v1947_v26 = vmul.f32 -1.442695, %v1068_v33  ;;  %v1069_v32 = vadd.f32 %v1022_v18, %v3389_v27  ;;  %v1071_v37 = vadd.f32 %v1063_v28, %v3390_v43  ;;  %v3393_v27 = vld [vmem:[#allocation14_spill] sm:$0xff]  ;;  %v3394_v43 = vld [vmem:[#allocation15_spill] sm:$0xff] }
 0x313   :  { %v1024_v16 = vpop.f32.mrf.mxu0  ;;  %v1065_v35 = vpop.f32.mrf.mxu1 }
 0x314   :  { %2170 = vpow2.f32 %v1947_v26  ;;  %v1948_v21 = vmul.f32 -1.442695, %v1069_v32  ;;  %v1949_v30 = vmul.f32 -1.442695, %v1071_v37 }
 0x315   :  { %v1025_v23 = vpop.f32.mrf.mxu0  ;;  %v1066_v38 = vpop.f32.mrf.mxu1 }
 0x316   :  { %2172 = vpow2.f32 %v1948_v21 }
 0x317   :  { %2174 = vtanh.f32 %v1070_v40 }
 0x318   :  { %2176 = vpow2.f32 %v1949_v30 }
 0x321   :  { %v2171_v46 = vpop.eup %2170 }
 0x322   :  { %v1075_v34 = vadd.f32 1.0, %v2171_v46 }
 0x323   :  { %v2173_v14 = vpop.eup %2172 }
 0x324   :  { %2178 = vrcp.f32 %v1075_v34  ;;  %v1081_v25 = vadd.f32 1.0, %v2173_v14  ;;  %v2175_v44 = vpop.eup %2174 }
 0x325   :  { %v2177_v22 = vpop.eup %2176 }
 0x326   :  { %2180 = vrcp.f32 %v1081_v25  ;;  %v1088_v41 = vadd.f32 1.0, %v2177_v22 }
 0x328   :  { %2182 = vrcp.f32 %v1088_v41 }
 0x331   :  { %v2179_v24 = vpop.eup %2178 }
 0x332   :  { %v1092_v29 = vmul.f32 %v2179_v24, %v2175_v44 }
 0x333   :  { %v2181_v15 = vpop.eup %2180 }
 0x334   :  { %v1091_v45 = vmul.f32 %v2181_v15, %v2836_v36 }
 0x335   :  { %v2183_v19 = vpop.eup %2182 }
 0x336   :  { %v2878_v17 = vadd.f32 %v1092_v29, %v1091_v45 }
 0x338   :  { %2184 = vtanh.f32 %v2878_v17 }
 0x345   :  { %v2185_v0 = vpop.eup %2184 }
 0x346   :  { %v1095_v20 = vmul.f32 %v2185_v0, %v2183_v19 }
 0x348   :  { %v1100_v33 = vpack.c.bf16 %v1095_v20, %v1095_v20 }
 0x34a   :  { %1134 = vmatmul.mubr.bf16.vlgmr.msra.gmra.mxu0 %v1100_v33  ;;  %1175 = vmatmul.mubr.bf16.vlgmr.msra.gmra.mxu1 %v1100_v33 }
 0x34b   :  { %1217 = vmatpush1.bf16.msra.mxu0 %v2430_v47  ;;  %1258 = vmatpush1.bf16.msra.mxu1 %v2435_v48  ;;  %v2916_v47 = vld [vmem:[%s3352_s3 + $0xe4] ss:$16 sps:$4 sm:$0xff]   ;;  %v2922_v48 = vld [vmem:[%s3352_s3 + $0xec] ss:$16 sps:$4 sm:$0xff]  }
 0x34c   :  { %1218 = vmatprep.subr.bf16.mxu0 %v2440_v49  ;;  %1259 = vmatprep.subr.bf16.mxu1 %v2445_v50 }
 0x34d   :  { %1248 = vmatprep.mubr.bf16.mxu0 %v3385_v31  ;;  %1289 = vmatprep.mubr.bf16.mxu1 %v3385_v31 }
 0x34f   :  { %1219 = vmatpush1.bf16.msra.mxu0 %v2453_v51  ;;  %1260 = vmatpush1.bf16.msra.mxu1 %v2460_v52  ;;  %v3392_v51 = vld [vmem:[#allocation12_spill] sm:$0xff] }
 0x350   :  { %1220 = vmatprep.subr.bf16.mxu0 %v2465_v53  ;;  %1261 = vmatprep.subr.bf16.mxu1 %v2472_v54 }
 0x353   :  { %1221 = vmatpush1.bf16.msra.mxu0 %v2479_v55  ;;  %1262 = vmatpush1.bf16.msra.mxu1 %v2486_v56 }
 0x354   :  { %1222 = vmatprep.subr.bf16.mxu0 %v2491_v57  ;;  %1263 = vmatprep.subr.bf16.mxu1 %v2497_v58 }
 0x357   :  { %1223 = vmatpush1.bf16.msra.mxu0 %v2505_v59  ;;  %1264 = vmatpush1.bf16.msra.mxu1 %v2512_v60 }
 0x358   :  { %1224 = vmatprep.subr.bf16.mxu0 %v2517_v61  ;;  %1265 = vmatprep.subr.bf16.mxu1 %v2524_v62 }
 0x35b   :  { %1225 = vmatpush1.bf16.msra.mxu0 %v2531_v63  ;;  %1266 = vmatpush1.bf16.msra.mxu1 %v2538_v1 }
 0x35c   :  { %1226 = vmatprep.subr.bf16.mxu0 %v2543_v2  ;;  %1267 = vmatprep.subr.bf16.mxu1 %v2549_v3 }
 0x35f   :  { %1227 = vmatpush1.bf16.msra.mxu0 %v2557_v4  ;;  %1268 = vmatpush1.bf16.msra.mxu1 %v2564_v5 }
 0x360   :  { %1228 = vmatprep.subr.bf16.mxu0 %v2569_v6  ;;  %1269 = vmatprep.subr.bf16.mxu1 %v2576_v7 }
 0x363   :  { %1229 = vmatpush1.bf16.msra.mxu0 %v2583_v8  ;;  %1270 = vmatpush1.bf16.msra.mxu1 %v2590_v9 }
 0x364   :  { %1230 = vmatprep.subr.bf16.mxu0 %v2595_v10  ;;  %1271 = vmatprep.subr.bf16.mxu1 %v2601_v11 }
 0x367   :  { %1231 = vmatpush1.bf16.msra.mxu0 %v2611_v12  ;;  %1272 = vmatpush1.bf16.msra.mxu1 %v2618_v13 }
 0x368   :  { %1331 = vmatprep.subr.bf16.mxu0 %v2916_v47  ;;  %1372 = vmatprep.subr.bf16.mxu1 %v2922_v48 }
 0x40a   :  { %v1135_v49 = vpop.f32.mrf.mxu0  ;;  %v1176_v50 = vpop.f32.mrf.mxu1 }
 0x40b   :  { %v1183_v36 = vadd.f32 %v1135_v49, %v3392_v51  ;;  %v1185_v40 = vadd.f32 %v1176_v50, %v3395_v42  ;;  %v2936_v50 = vld [vmem:[%s3352_s3 + $0xe0] ss:$16 sps:$4 sm:$0xff]   ;;  %v2948_v51 = vld [vmem:[%s3352_s3 + $0xc4] ss:$16 sps:$4 sm:$0xff]  }
 0x40c   :  { %v1137_v18 = vpop.f32.mrf.mxu0  ;;  %v1178_v28 = vpop.f32.mrf.mxu1  ;;  %v3016_v42 = vld [vmem:[%s3352_s3 + $0xa4] ss:$16 sps:$4 sm:$0xff]  }
 0x40d   :  { %v1950_v26 = vmul.f32 -1.442695, %v1183_v36  ;;  %v1184_v32 = vadd.f32 %v1137_v18, %v3393_v27  ;;  %v1186_v37 = vadd.f32 %v1178_v28, %v3394_v43  ;;  %v2954_v36 = vld [vmem:[%s3352_s3 + $0xcc] ss:$16 sps:$4 sm:$0xff]   ;;  %v2962_v18 = vld [vmem:[%s3352_s3 + $0xc0] ss:$16 sps:$4 sm:$0xff]  }
 0x40e   :  { %v1139_v16 = vpop.f32.mrf.mxu0  ;;  %v1180_v35 = vpop.f32.mrf.mxu1 }
 0x40f   :  { %2186 = vpow2.f32 %v1950_v26  ;;  %v1951_v21 = vmul.f32 -1.442695, %v1184_v32  ;;  %v1952_v30 = vmul.f32 -1.442695, %v1186_v37  ;;  %v3010_v37 = vld [vmem:[%s3352_s3 + $0xc8] ss:$16 sps:$4 sm:$0xff]  }
 0x410   :  { %v1140_v23 = vpop.f32.mrf.mxu0  ;;  %v1181_v38 = vpop.f32.mrf.mxu1 }
 0x411   :  { %2188 = vpow2.f32 %v1951_v21 }
 0x412   :  { %2190 = vtanh.f32 %v1185_v40  ;;  %v3022_v40 = vld [vmem:[%s3352_s3 + $0xac] ss:$16 sps:$4 sm:$0xff]  }
 0x413   :  { %2192 = vpow2.f32 %v1952_v30  ;;  %v3028_v30 = vld [vmem:[%s3352_s3 + $0xa0] ss:$16 sps:$4 sm:$0xff]  }
 0x41c   :  { %v2187_v46 = vpop.eup %2186 }
 0x41d   :  { %v1190_v34 = vadd.f32 1.0, %v2187_v46  ;;  %v3034_v46 = vld [vmem:[%s3352_s3 + $0xa8] ss:$16 sps:$4 sm:$0xff]  }
 0x41e   :  { %v2189_v14 = vpop.eup %2188 }
 0x41f   :  { %2194 = vrcp.f32 %v1190_v34  ;;  %v1196_v25 = vadd.f32 1.0, %v2189_v14  ;;  %v2191_v44 = vpop.eup %2190  ;;  %v3040_v34 = vld [vmem:[%s3352_s3 + $0x84] ss:$16 sps:$4 sm:$0xff]   ;;  %v3046_v14 = vld [vmem:[%s3352_s3 + $0x8c] ss:$16 sps:$4 sm:$0xff]  }
 0x420   :  { %v2193_v22 = vpop.eup %2192 }
 0x421   :  { %2196 = vrcp.f32 %v1196_v25  ;;  %v1203_v41 = vadd.f32 1.0, %v2193_v22  ;;  %v3052_v25 = vld [vmem:[%s3352_s3 + $0x80] ss:$16 sps:$4 sm:$0xff]   ;;  %v3064_v22 = vld [vmem:[%s3352_s3 + $0x64] ss:$16 sps:$4 sm:$0xff]  }
 0x423   :  { %2198 = vrcp.f32 %v1203_v41  ;;  %v3088_v41 = vld [vmem:[%s3352_s3 + $0x44] ss:$16 sps:$4 sm:$0xff]  }
 0x42c   :  { %v2195_v24 = vpop.eup %2194 }
 0x42d   :  { %v1207_v29 = vmul.f32 %v2195_v24, %v2191_v44  ;;  %v3058_v44 = vld [vmem:[%s3352_s3 + $0x88] ss:$16 sps:$4 sm:$0xff]   ;;  %v3070_v24 = vld [vmem:[%s3352_s3 + $0x6c] ss:$16 sps:$4 sm:$0xff]  }
 0x42e   :  { %v2197_v15 = vpop.eup %2196 }
 0x42f   :  { %v1206_v45 = vmul.f32 %v2197_v15, %v2878_v17  ;;  %v2942_v17 = vld [vmem:[%s3352_s3 + $0xe8] ss:$16 sps:$4 sm:$0xff]  }
 0x430   :  { %v2199_v0 = vpop.eup %2198  ;;  %v3082_v15 = vld [vmem:[%s3352_s3 + $0x68] ss:$16 sps:$4 sm:$0xff]  }
 0x431   :  { %v2930_v19 = vadd.f32 %v1207_v29, %v1206_v45  ;;  %v3076_v29 = vld [vmem:[%s3352_s3 + $0x60] ss:$16 sps:$4 sm:$0xff]   ;;  %v3094_v45 = vld [vmem:[%s3352_s3 + $0x4c] ss:$16 sps:$4 sm:$0xff]  }
 0x433   :  { %2200 = vtanh.f32 %v2930_v19 }
 0x440   :  { %v2201_v20 = vpop.eup %2200 }
 0x441   :  { %v1210_v33 = vmul.f32 %v2201_v20, %v2199_v0  ;;  %v3106_v0 = vld [vmem:[%s3352_s3 + $0x48] ss:$16 sps:$4 sm:$0xff]   ;;  %v3112_v20 = vld [vmem:[%s3352_s3 + $0x24] ss:$16 sps:$4 sm:$0xff]  }
 0x443   :  { %v1215_v49 = vpack.c.bf16 %v1210_v33, %v1210_v33  ;;  %v3118_v33 = vld [vmem:[%s3352_s3 + $0x2c] ss:$16 sps:$4 sm:$0xff]  }
 0x445   :  { %1249 = vmatmul.mubr.bf16.vlgmr.msra.gmra.mxu0 %v1215_v49  ;;  %1290 = vmatmul.mubr.bf16.vlgmr.msra.gmra.mxu1 %v1215_v49  ;;  %v3124_v49 = vld [vmem:[%s3352_s3 + $0x20] ss:$16 sps:$4 sm:$0xff]  }
 0x446   :  { %1332 = vmatpush1.bf16.msra.mxu0 %v2936_v50  ;;  %1373 = vmatpush1.bf16.msra.mxu1 %v2942_v17 }
 0x447   :  { %1333 = vmatprep.subr.bf16.mxu0 %v2948_v51  ;;  %1374 = vmatprep.subr.bf16.mxu1 %v2954_v36 }
 0x448   :  { %1363 = vmatprep.mubr.bf16.mxu0 %v3385_v31  ;;  %1404 = vmatprep.mubr.bf16.mxu1 %v3385_v31 }
 0x44a   :  { %1334 = vmatpush1.bf16.msra.mxu0 %v2962_v18  ;;  %1375 = vmatpush1.bf16.msra.mxu1 %v2460_v52 }
 0x44b   :  { %1335 = vmatprep.subr.bf16.mxu0 %v2465_v53  ;;  %1376 = vmatprep.subr.bf16.mxu1 %v2472_v54  ;;  %v3396_v54 = vld [vmem:[#allocation16_spill] sm:$0xff] }
 0x44e   :  { %1336 = vmatpush1.bf16.msra.mxu0 %v2479_v55  ;;  %1377 = vmatpush1.bf16.msra.mxu1 %v2486_v56 }
 0x44f   :  { %1337 = vmatprep.subr.bf16.mxu0 %v2491_v57  ;;  %1378 = vmatprep.subr.bf16.mxu1 %v2497_v58 }
 0x452   :  { %1338 = vmatpush1.bf16.msra.mxu0 %v2505_v59  ;;  %1379 = vmatpush1.bf16.msra.mxu1 %v2512_v60  ;;  %v3397_v59 = vld [vmem:[#allocation18_spill] sm:$0xff] }
 0x453   :  { %1339 = vmatprep.subr.bf16.mxu0 %v2517_v61  ;;  %1380 = vmatprep.subr.bf16.mxu1 %v2524_v62 }
 0x456   :  { %1340 = vmatpush1.bf16.msra.mxu0 %v2531_v63  ;;  %1381 = vmatpush1.bf16.msra.mxu1 %v2538_v1 }
 0x457   :  { %1341 = vmatprep.subr.bf16.mxu0 %v2543_v2  ;;  %1382 = vmatprep.subr.bf16.mxu1 %v2549_v3  ;;  %v3398_v3 = vld [vmem:[#allocation19_spill] sm:$0xff] }
 0x45a   :  { %1342 = vmatpush1.bf16.msra.mxu0 %v2557_v4  ;;  %1383 = vmatpush1.bf16.msra.mxu1 %v2564_v5  ;;  %v3399_v5 = vld [vmem:[#allocation17_spill] sm:$0xff] }
 0x45b   :  { %1343 = vmatprep.subr.bf16.mxu0 %v2569_v6  ;;  %1384 = vmatprep.subr.bf16.mxu1 %v2576_v7 }
 0x45e   :  { %1344 = vmatpush1.bf16.msra.mxu0 %v2583_v8  ;;  %1385 = vmatpush1.bf16.msra.mxu1 %v2590_v9 }
 0x45f   :  { %1345 = vmatprep.subr.bf16.mxu0 %v2595_v10  ;;  %1386 = vmatprep.subr.bf16.mxu1 %v2601_v11 }
 0x462   :  { %1346 = vmatpush1.bf16.msra.mxu0 %v2611_v12  ;;  %1387 = vmatpush1.bf16.msra.mxu1 %v2618_v13 }
 0x463   :  { %1446 = vmatprep.subr.bf16.mxu0 %v2916_v47  ;;  %1487 = vmatprep.subr.bf16.mxu1 %v2922_v48 }
 0x505   :  { %v1250_v52 = vpop.f32.mrf.mxu0  ;;  %v1291_v53 = vpop.f32.mrf.mxu1 }
 0x506   :  { %v1298_v55 = vadd.f32 %v1250_v52, %v3396_v54  ;;  %v1300_v6 = vadd.f32 %v1291_v53, %v3399_v5  ;;  %v3130_v52 = vld [vmem:[%s3352_s3 + $0x28] ss:$16 sps:$4 sm:$0xff]   ;;  %v3136_v53 = vld [vmem:[%s3352_s3 + $0x4] ss:$16 sps:$4 sm:$0xff]   ;;  %v3142_v54 = vld [vmem:[%s3352_s3 + $0xc] ss:$16 sps:$4 sm:$0xff]  }
 0x507   :  { %v1252_v56 = vpop.f32.mrf.mxu0  ;;  %v1293_v57 = vpop.f32.mrf.mxu1 }
 0x508   :  { %v1953_v58 = vmul.f32 -1.442695, %v1298_v55  ;;  %v1299_v60 = vadd.f32 %v1252_v56, %v3397_v59  ;;  %v1301_v4 = vadd.f32 %v1293_v57, %v3398_v3  ;;  %v3148_v55 = vld [vmem:[%s3352_s3] ss:$16 sps:$4 sm:$0xff]   ;;  %v3154_v56 = vld [vmem:[%s3352_s3 + $0x8] ss:$16 sps:$4 sm:$0xff]  }
 0x509   :  { %v1254_v61 = vpop.f32.mrf.mxu0  ;;  %v1295_v62 = vpop.f32.mrf.mxu1  ;;  %v3400_v59 = vld [vmem:[#allocation20_spill] sm:$0xff] }
 0x50a   :  { %2202 = vpow2.f32 %v1953_v58  ;;  %v1954_v63 = vmul.f32 -1.442695, %v1299_v60  ;;  %v1955_v7 = vmul.f32 -1.442695, %v1301_v4 }
 0x50b   :  { %v1255_v1 = vpop.f32.mrf.mxu0  ;;  %v1296_v2 = vpop.f32.mrf.mxu1 }
 0x50c   :  { %2204 = vpow2.f32 %v1954_v63  ;;  %v3401_v1 = vld [vmem:[#allocation22_spill] sm:$0xff] }
 0x50d   :  { %2206 = vtanh.f32 %v1300_v6 }
 0x50e   :  { %2208 = vpow2.f32 %v1955_v7 }
 0x517   :  { %v2203_v8 = vpop.eup %2202 }
 0x518   :  { %v1305_v9 = vadd.f32 1.0, %v2203_v8  ;;  %v3402_v8 = vld [vmem:[#allocation23_spill] sm:$0xff] }
 0x519   :  { %v2205_v10 = vpop.eup %2204 }
 0x51a   :  { %2210 = vrcp.f32 %v1305_v9  ;;  %v1311_v11 = vadd.f32 1.0, %v2205_v10  ;;  %v2207_v12 = vpop.eup %2206  ;;  %v3403_v9 = vld [vmem:[#allocation21_spill] sm:$0xff] }
 0x51b   :  { %v2209_v13 = vpop.eup %2208 }
 0x51c   :  { %2212 = vrcp.f32 %v1311_v11  ;;  %v1318_v32 = vadd.f32 1.0, %v2209_v13 }
 0x51e   :  { %2214 = vrcp.f32 %v1318_v32 }
 0x527   :  { %v2211_v28 = vpop.eup %2210 }
 0x528   :  { %v1322_v26 = vmul.f32 %v2211_v28, %v2207_v12 }
 0x529   :  { %v2213_v27 = vpop.eup %2212 }
 0x52a   :  { %v1321_v16 = vmul.f32 %v2213_v27, %v2930_v19  ;;  %v3100_v19 = vld [vmem:[%s3352_s3 + $0x40] ss:$16 sps:$4 sm:$0xff]  }
 0x52b   :  { %v2215_v21 = vpop.eup %2214 }
 0x52c   :  { %v2997_v35 = vadd.f32 %v1322_v26, %v1321_v16 }
 0x52e   :  { %2216 = vtanh.f32 %v2997_v35 }
 0x53b   :  { %v2217_v23 = vpop.eup %2216 }
 0x53c   :  { %v1325_v38 = vmul.f32 %v2217_v23, %v2215_v21 }
 0x53e   :  { %v1330_v43 = vpack.c.bf16 %v1325_v38, %v1325_v38 }
 0x540   :  { %1364 = vmatmul.mubr.bf16.vlgmr.msra.gmra.mxu0 %v1330_v43  ;;  %1405 = vmatmul.mubr.bf16.vlgmr.msra.gmra.mxu1 %v1330_v43 }
 0x541   :  { %1447 = vmatpush1.bf16.msra.mxu0 %v2936_v50  ;;  %1488 = vmatpush1.bf16.msra.mxu1 %v2942_v17 }
 0x542   :  { %1448 = vmatprep.subr.bf16.mxu0 %v2948_v51  ;;  %1489 = vmatprep.subr.bf16.mxu1 %v2954_v36 }
 0x543   :  { %1478 = vmatprep.mubr.bf16.mxu0 %v3385_v31  ;;  %1519 = vmatprep.mubr.bf16.mxu1 %v3385_v31 }
 0x545   :  { %1449 = vmatpush1.bf16.msra.mxu0 %v2962_v18  ;;  %1490 = vmatpush1.bf16.msra.mxu1 %v3010_v37 }
 0x546   :  { %1450 = vmatprep.subr.bf16.mxu0 %v3016_v42  ;;  %1491 = vmatprep.subr.bf16.mxu1 %v3022_v40 }
 0x549   :  { %1451 = vmatpush1.bf16.msra.mxu0 %v3028_v30  ;;  %1492 = vmatpush1.bf16.msra.mxu1 %v3034_v46 }
 0x54a   :  { %1452 = vmatprep.subr.bf16.mxu0 %v3040_v34  ;;  %1493 = vmatprep.subr.bf16.mxu1 %v3046_v14 }
 0x54d   :  { %1453 = vmatpush1.bf16.msra.mxu0 %v3052_v25  ;;  %1494 = vmatpush1.bf16.msra.mxu1 %v3058_v44 }
 0x54e   :  { %1454 = vmatprep.subr.bf16.mxu0 %v3064_v22  ;;  %1495 = vmatprep.subr.bf16.mxu1 %v3070_v24 }
 0x551   :  { %1455 = vmatpush1.bf16.msra.mxu0 %v3076_v29  ;;  %1496 = vmatpush1.bf16.msra.mxu1 %v3082_v15 }
 0x552   :  { %1456 = vmatprep.subr.bf16.mxu0 %v3088_v41  ;;  %1497 = vmatprep.subr.bf16.mxu1 %v3094_v45 }
 0x555   :  { %1457 = vmatpush1.bf16.msra.mxu0 %v3100_v19  ;;  %1498 = vmatpush1.bf16.msra.mxu1 %v3106_v0 }
 0x556   :  { %1458 = vmatprep.subr.bf16.mxu0 %v3112_v20  ;;  %1499 = vmatprep.subr.bf16.mxu1 %v3118_v33 }
 0x559   :  { %1459 = vmatpush1.bf16.msra.mxu0 %v3124_v49  ;;  %1500 = vmatpush1.bf16.msra.mxu1 %v3130_v52 }
 0x55a   :  { %1460 = vmatprep.subr.bf16.mxu0 %v3136_v53  ;;  %1501 = vmatprep.subr.bf16.mxu1 %v3142_v54 }
 0x55d   :  { %1461 = vmatpush1.bf16.msra.mxu0 %v3148_v55  ;;  %1502 = vmatpush1.bf16.msra.mxu1 %v3154_v56 }
 0x55e   :  { %1561 = vmatprep.subr.bf16.mxu0 %v2916_v47  ;;  %1602 = vmatprep.subr.bf16.mxu1 %v2922_v48 }
 0x600   :  { %v1365_v57 = vpop.f32.mrf.mxu0  ;;  %v1406_v58 = vpop.f32.mrf.mxu1 }
 0x601   :  { %v1413_v60 = vadd.f32 %v1365_v57, %v3400_v59  ;;  %v1415_v48 = vadd.f32 %v1406_v58, %v3403_v9  ;;  %v1713_v9 = vld [vmem:[%s3354_s5 + $0x38] sm:$0xff] }
 0x602   :  { %v1367_v61 = vpop.f32.mrf.mxu0  ;;  %v1408_v62 = vpop.f32.mrf.mxu1 }
 0x603   :  { %v1956_v63 = vmul.f32 -1.442695, %v1413_v60  ;;  %v1414_v2 = vadd.f32 %v1367_v61, %v3401_v1  ;;  %v1416_v47 = vadd.f32 %v1408_v62, %v3402_v8  ;;  %v1715_v8 = vld [vmem:[%s3354_s5 + $0x48] sm:$0xff] }
 0x604   :  { %v1369_v3 = vpop.f32.mrf.mxu0  ;;  %v1410_v4 = vpop.f32.mrf.mxu1 }
 0x605   :  { %2218 = vpow2.f32 %v1956_v63  ;;  %v1957_v5 = vmul.f32 -1.442695, %v1414_v2  ;;  %v1958_v10 = vmul.f32 -1.442695, %v1416_v47  ;;  %v1721_v2 = vld [vmem:[%s3354_s5 + $0x78] sm:$0xff]  ;;  %v1720_v3 = vld [vmem:[%s3354_s5 + $0x70] sm:$0xff] }
 0x606   :  { %v1370_v6 = vpop.f32.mrf.mxu0  ;;  %v1411_v7 = vpop.f32.mrf.mxu1  ;;  %v1719_v4 = vld [vmem:[%s3354_s5 + $0x68] sm:$0xff]  ;;  %v1714_v47 = vld [vmem:[%s3354_s5 + $0x40] sm:$0xff] }
 0x607   :  { %2220 = vpow2.f32 %v1957_v5  ;;  %v1718_v5 = vld [vmem:[%s3354_s5 + $0x60] sm:$0xff]  ;;  %v1717_v6 = vld [vmem:[%s3354_s5 + $0x58] sm:$0xff]  ;;  %v1716_v7 = vld [vmem:[%s3354_s5 + $0x50] sm:$0xff] }
 0x608   :  { %2222 = vtanh.f32 %v1415_v48  ;;  %v1712_v48 = vld [vmem:[%s3354_s5 + $0x30] sm:$0xff] }
 0x609   :  { %2224 = vpow2.f32 %v1958_v10  ;;  %v1711_v10 = vld [vmem:[%s3354_s5 + $0x28] sm:$0xff] }
 0x612   :  { %v2219_v11 = vpop.eup %2218 }
 0x613   :  { %v1420_v12 = vadd.f32 1.0, %v2219_v11  ;;  %v1710_v11 = vld [vmem:[%s3354_s5 + $0x20] sm:$0xff] }
 0x614   :  { %v2221_v13 = vpop.eup %2220 }
 0x615   :  { %2226 = vrcp.f32 %v1420_v12  ;;  %v1426_v28 = vadd.f32 1.0, %v2221_v13  ;;  %v2223_v26 = vpop.eup %2222  ;;  %v1709_v12 = vld [vmem:[%s3354_s5 + $0x18] sm:$0xff]  ;;  %v1708_v13 = vld [vmem:[%s3354_s5 + $0x10] sm:$0xff] }
 0x616   :  { %v2225_v27 = vpop.eup %2224 }
 0x617   :  { %2228 = vrcp.f32 %v1426_v28  ;;  %v1433_v23 = vadd.f32 1.0, %v2225_v27  ;;  %v1707_v28 = vld [vmem:[%s3354_s5 + $0x8] sm:$0xff]  ;;  %v1705_v27 = vld [vmem:[%s3353_s4 + $0x78] sm:$0xff] }
 0x619   :  { %2230 = vrcp.f32 %v1433_v23  ;;  %v1700_v23 = vld [vmem:[%s3353_s4 + $0x50] sm:$0xff] }
 0x622   :  { %v2227_v32 = vpop.eup %2226 }
 0x623   :  { %v1437_v16 = vmul.f32 %v2227_v32, %v2223_v26  ;;  %v1706_v26 = vld [vmem:[%s3354_s5] sm:$0xff]  ;;  %v1704_v32 = vld [vmem:[%s3353_s4 + $0x70] sm:$0xff] }
 0x624   :  { %v2229_v21 = vpop.eup %2228 }
 0x625   :  { %v1436_v38 = vmul.f32 %v2229_v21, %v2997_v35  ;;  %v1701_v21 = vld [vmem:[%s3353_s4 + $0x58] sm:$0xff] }
 0x626   :  { %v2231_v57 = vpop.eup %2230 }
 0x627   :  { %v3164_v43 = vadd.f32 %v1437_v16, %v1436_v38  ;;  %v1703_v16 = vld [vmem:[%s3353_s4 + $0x68] sm:$0xff] }
 0x628   :  { %v1699_v38 = vld [vmem:[%s3353_s4 + $0x48] sm:$0xff] }
 0x629   :  { %2232 = vtanh.f32 %v3164_v43 }
 0x636   :  { %v2233_v58 = vpop.eup %2232 }
 0x637   :  { %v1440_v59 = vmul.f32 %v2233_v58, %v2231_v57  ;;  %v1697_v57 = vld [vmem:[%s3353_s4 + $0x38] sm:$0xff]  ;;  %v1696_v58 = vld [vmem:[%s3353_s4 + $0x30] sm:$0xff] }
 0x639   :  { %v1445_v60 = vpack.c.bf16 %v1440_v59, %v1440_v59  ;;  %v1695_v59 = vld [vmem:[%s3353_s4 + $0x28] sm:$0xff] }
 0x63b   :  { %1479 = vmatmul.mubr.bf16.vlgmr.msra.gmra.mxu0 %v1445_v60  ;;  %1520 = vmatmul.mubr.bf16.vlgmr.msra.gmra.mxu1 %v1445_v60  ;;  %v1694_v60 = vld [vmem:[%s3353_s4 + $0x20] sm:$0xff] }
 0x63c   :  { %1562 = vmatpush1.bf16.msra.mxu0 %v2936_v50  ;;  %1603 = vmatpush1.bf16.msra.mxu1 %v2942_v17 }
 0x63d   :  { %1563 = vmatprep.subr.bf16.mxu0 %v2948_v51  ;;  %1604 = vmatprep.subr.bf16.mxu1 %v2954_v36  ;;  %v3404_v51 = vld [vmem:[#allocation24_spill] sm:$0xff] }
 0x63e   :  { %1593 = vmatprep.mubr.bf16.mxu0 %v3385_v31  ;;  %1634 = vmatprep.mubr.bf16.mxu1 %v3385_v31  ;;  %v2324_v31 = vmov 0.0  }
 0x640   :  { %1564 = vmatpush1.bf16.msra.mxu0 %v2962_v18  ;;  %1605 = vmatpush1.bf16.msra.mxu1 %v3010_v37 }
 0x641   :  { %1565 = vmatprep.subr.bf16.mxu0 %v3016_v42  ;;  %1606 = vmatprep.subr.bf16.mxu1 %v3022_v40  ;;  %v3405_v42 = vld [vmem:[#allocation26_spill] sm:$0xff] }
 0x644   :  { %1566 = vmatpush1.bf16.msra.mxu0 %v3028_v30  ;;  %1607 = vmatpush1.bf16.msra.mxu1 %v3034_v46 }
 0x645   :  { %1567 = vmatprep.subr.bf16.mxu0 %v3040_v34  ;;  %1608 = vmatprep.subr.bf16.mxu1 %v3046_v14 }
 0x648   :  { %1568 = vmatpush1.bf16.msra.mxu0 %v3052_v25  ;;  %1609 = vmatpush1.bf16.msra.mxu1 %v3058_v44  ;;  %v3406_v44 = vld [vmem:[#allocation27_spill] sm:$0xff] }
 0x649   :  { %1569 = vmatprep.subr.bf16.mxu0 %v3064_v22  ;;  %1610 = vmatprep.subr.bf16.mxu1 %v3070_v24  ;;  %v3407_v24 = vld [vmem:[#allocation25_spill] sm:$0xff] }
 0x64c   :  { %1570 = vmatpush1.bf16.msra.mxu0 %v3076_v29  ;;  %1611 = vmatpush1.bf16.msra.mxu1 %v3082_v15 }
 0x64d   :  { %1571 = vmatprep.subr.bf16.mxu0 %v3088_v41  ;;  %1612 = vmatprep.subr.bf16.mxu1 %v3094_v45 }
 0x650   :  { %1572 = vmatpush1.bf16.msra.mxu0 %v3100_v19  ;;  %1613 = vmatpush1.bf16.msra.mxu1 %v3106_v0 }
 0x651   :  { %1573 = vmatprep.subr.bf16.mxu0 %v3112_v20  ;;  %1614 = vmatprep.subr.bf16.mxu1 %v3118_v33 }
 0x654   :  { %1574 = vmatpush1.bf16.msra.mxu0 %v3124_v49  ;;  %1615 = vmatpush1.bf16.msra.mxu1 %v3130_v52 }
 0x655   :  { %1575 = vmatprep.subr.bf16.mxu0 %v3136_v53  ;;  %1616 = vmatprep.subr.bf16.mxu1 %v3142_v54 }
 0x658   :  { %1576 = vmatpush1.bf16.msra.mxu0 %v3148_v55  ;;  %1617 = vmatpush1.bf16.msra.mxu1 %v3154_v56 }
 0x659   :  { %2002 = vmatprep.subr.mxu0 %v2324_v31  ;;  %2037 = vmatprep.subr.mxu1 %v2324_v31 }
 0x6fb   :  { %v1480_v50 = vpop.f32.mrf.mxu0  ;;  %v1521_v17 = vpop.f32.mrf.mxu1 }
 0x6fc   :  { %v1528_v36 = vadd.f32 %v1480_v50, %v3404_v51  ;;  %v1530_v29 = vadd.f32 %v1521_v17, %v3407_v24  ;;  %v1693_v50 = vld [vmem:[%s3353_s4 + $0x18] sm:$0xff]  ;;  %v1692_v17 = vld [vmem:[%s3353_s4 + $0x10] sm:$0xff]  ;;  %v1691_v51 = vld [vmem:[%s3353_s4 + $0x8] sm:$0xff] }
 0x6fd   :  { %v1482_v18 = vpop.f32.mrf.mxu0  ;;  %v1523_v35 = vpop.f32.mrf.mxu1 }
 0x6fe   :  { %v1959_v37 = vmul.f32 -1.442695, %v1528_v36  ;;  %v1529_v40 = vadd.f32 %v1482_v18, %v3405_v42  ;;  %v1531_v22 = vadd.f32 %v1523_v35, %v3406_v44  ;;  %v1690_v36 = vld [vmem:[%s3353_s4] sm:$0xff] }
 0x6ff   :  { %v1484_v30 = vpop.f32.mrf.mxu0  ;;  %v1525_v46 = vpop.f32.mrf.mxu1 }
 0x700   :  { %2234 = vpow2.f32 %v1959_v37  ;;  %v1960_v34 = vmul.f32 -1.442695, %v1529_v40  ;;  %v1961_v15 = vmul.f32 -1.442695, %v1531_v22  ;;  %v3408_v37 = vld [vmem:[#allocation28_spill] sm:$0xff] }
 0x701   :  { %v1485_v14 = vpop.f32.mrf.mxu0  ;;  %v1526_v25 = vpop.f32.mrf.mxu1 }
 0x702   :  { %2236 = vpow2.f32 %v1960_v34  ;;  %v3409_v34 = vld [vmem:[#allocation30_spill] sm:$0xff] }
 0x703   :  { %2238 = vtanh.f32 %v1530_v29 }
 0x704   :  { %2240 = vpow2.f32 %v1961_v15  ;;  %v3410_v15 = vld [vmem:[#allocation31_spill] sm:$0xff] }
 0x70d   :  { %v2235_v41 = vpop.eup %2234 }
 0x70e   :  { %v1535_v45 = vadd.f32 1.0, %v2235_v41 }
 0x70f   :  { %v2237_v19 = vpop.eup %2236 }
 0x710   :  { %2242 = vrcp.f32 %v1535_v45  ;;  %v1541_v0 = vadd.f32 1.0, %v2237_v19  ;;  %v2239_v20 = vpop.eup %2238 }
 0x711   :  { %v2241_v33 = vpop.eup %2240 }
 0x712   :  { %2244 = vrcp.f32 %v1541_v0  ;;  %v1548_v54 = vadd.f32 1.0, %v2241_v33 }
 0x714   :  { %2246 = vrcp.f32 %v1548_v54 }
 0x71d   :  { %v2243_v49 = vpop.eup %2242 }
 0x71e   :  { %v1552_v52 = vmul.f32 %v2243_v49, %v2239_v20 }
 0x71f   :  { %v2245_v53 = vpop.eup %2244 }
 0x720   :  { %v1551_v55 = vmul.f32 %v2245_v53, %v3164_v43  ;;  %v1698_v43 = vld [vmem:[%s3353_s4 + $0x40] sm:$0xff] }
 0x721   :  { %v2247_v61 = vpop.eup %2246 }
 0x722   :  { %v3206_v56 = vadd.f32 %v1552_v52, %v1551_v55 }
 0x724   :  { %2248 = vtanh.f32 %v3206_v56 }
 0x731   :  { %v2249_v62 = vpop.eup %2248 }
 0x732   :  { %v1555_v63 = vmul.f32 %v2249_v62, %v2247_v61 }
 0x734   :  { %v1560_v1 = vpack.c.bf16 %v1555_v63, %v1555_v63 }
 0x736   :  { %1594 = vmatmul.mubr.bf16.vlgmr.msra.gmra.mxu0 %v1560_v1  ;;  %1635 = vmatmul.mubr.bf16.vlgmr.msra.gmra.mxu1 %v1560_v1 }
 0x737   :  { %2003 = vmatpush3.msra.mxu0 %v1721_v2  ;;  %2034 = vmatprep.mubr.msk.f32.mxu0 %vm2325_vm1, %v2324_v31 }
 0x738   :  { %2004 = vmatprep.subr.mxu0 %v2324_v31  ;;  %2069 = vmatprep.mubr.msk.f32.mxu1 %vm2325_vm1, %v2324_v31 }
 0x739   :  { %2005 = vmatpush3.msra.mxu0 %v1720_v3  ;;  %2038 = vmatpush3.msra.mxu1 %v1705_v27 }
 0x73a   :  { %2006 = vmatprep.subr.mxu0 %v2324_v31  ;;  %2039 = vmatprep.subr.mxu1 %v2324_v31 }
 0x73b   :  { %2007 = vmatpush3.msra.mxu0 %v1719_v4  ;;  %2040 = vmatpush3.msra.mxu1 %v1704_v32 }
 0x73c   :  { %2008 = vmatprep.subr.mxu0 %v2324_v31  ;;  %2041 = vmatprep.subr.mxu1 %v2324_v31 }
 0x73d   :  { %2009 = vmatpush3.msra.mxu0 %v1718_v5  ;;  %2042 = vmatpush3.msra.mxu1 %v1703_v16 }
 0x73e   :  { %2010 = vmatprep.subr.mxu0 %v2324_v31  ;;  %2043 = vmatprep.subr.mxu1 %v2324_v31 }
 0x73f   :  { %2011 = vmatpush3.msra.mxu0 %v1717_v6 }
 0x740   :  { %2012 = vmatprep.subr.mxu0 %v2324_v31 }
 0x741   :  { %2013 = vmatpush3.msra.mxu0 %v1716_v7 }
 0x742   :  { %2014 = vmatprep.subr.mxu0 %v2324_v31 }
 0x743   :  { %2015 = vmatpush3.msra.mxu0 %v1715_v8  ;;  %v1967_v8 = vld [vmem:[%s3355_s6] ss:$0 sm:$0xff] }
 0x744   :  { %2016 = vmatprep.subr.mxu0 %v2324_v31 }
 0x745   :  { %2017 = vmatpush3.msra.mxu0 %v1714_v47 }
 0x746   :  { %2018 = vmatprep.subr.mxu0 %v2324_v31 }
 0x747   :  { %2019 = vmatpush3.msra.mxu0 %v1713_v9 }
 0x748   :  { %2020 = vmatprep.subr.mxu0 %v2324_v31 }
 0x749   :  { %2021 = vmatpush3.msra.mxu0 %v1712_v48 }
 0x74a   :  { %2022 = vmatprep.subr.mxu0 %v2324_v31 }
 0x74b   :  { %2023 = vmatpush3.msra.mxu0 %v1711_v10 }
 0x74c   :  { %2024 = vmatprep.subr.mxu0 %v2324_v31 }
 0x74d   :  { %2025 = vmatpush3.msra.mxu0 %v1710_v11 }
 0x74e   :  { %2026 = vmatprep.subr.mxu0 %v2324_v31 }
 0x74f   :  { %2027 = vmatpush3.msra.mxu0 %v1709_v12 }
 0x750   :  { %2028 = vmatprep.subr.mxu0 %v2324_v31 }
 0x751   :  { %2029 = vmatpush3.msra.mxu0 %v1708_v13 }
 0x752   :  { %2030 = vmatprep.subr.mxu0 %v2324_v31 }
 0x753   :  { %2031 = vmatpush3.msra.mxu0 %v1707_v28 }
 0x754   :  { %2032 = vmatprep.subr.mxu0 %v2324_v31 }
 0x755   :  { %2033 = vmatpush3.msra.mxu0 %v1706_v26 }
 0x756   :  { %2035 = vmatmul.mubr.f32.vlgmr.msra.gmra.mxu0 %v2795_v39  ;;  %v1702_v39 = vld [vmem:[%s3353_s4 + $0x60] sm:$0xff] }
 0x757   :  { %2044 = vmatpush3.msra.mxu1 %v1702_v39 }
 0x758   :  { %2045 = vmatprep.subr.mxu1 %v2324_v31 }
 0x759   :  { %2046 = vmatpush3.msra.mxu1 %v1701_v21 }
 0x75a   :  { %2047 = vmatprep.subr.mxu1 %v2324_v31 }
 0x75b   :  { %2048 = vmatpush3.msra.mxu1 %v1700_v23 }
 0x75c   :  { %2049 = vmatprep.subr.mxu1 %v2324_v31 }
 0x75d   :  { %2050 = vmatpush3.msra.mxu1 %v1699_v38 }
 0x75e   :  { %2051 = vmatprep.subr.mxu1 %v2324_v31 }
 0x75f   :  { %2052 = vmatpush3.msra.mxu1 %v1698_v43 }
 0x760   :  { %2053 = vmatprep.subr.mxu1 %v2324_v31 }
 0x761   :  { %2054 = vmatpush3.msra.mxu1 %v1697_v57 }
 0x762   :  { %2055 = vmatprep.subr.mxu1 %v2324_v31 }
 0x763   :  { %2056 = vmatpush3.msra.mxu1 %v1696_v58 }
 0x764   :  { %2057 = vmatprep.subr.mxu1 %v2324_v31 }
 0x765   :  { %2058 = vmatpush3.msra.mxu1 %v1695_v59 }
 0x766   :  { %2059 = vmatprep.subr.mxu1 %v2324_v31 }
 0x767   :  { %2060 = vmatpush3.msra.mxu1 %v1694_v60 }
 0x768   :  { %2061 = vmatprep.subr.mxu1 %v2324_v31 }
 0x769   :  { %2062 = vmatpush3.msra.mxu1 %v1693_v50 }
 0x76a   :  { %2063 = vmatprep.subr.mxu1 %v2324_v31 }
 0x76b   :  { %2064 = vmatpush3.msra.mxu1 %v1692_v17 }
 0x76c   :  { %2065 = vmatprep.subr.mxu1 %v2324_v31 }
 0x76d   :  { %2066 = vmatpush3.msra.mxu1 %v1691_v51 }
 0x76e   :  { %2067 = vmatprep.subr.mxu1 %v2324_v31  ;;  %v3411_v31 = vld [vmem:[#allocation29_spill] sm:$0xff] }
 0x76f   :  { %2068 = vmatpush3.msra.mxu1 %v1690_v36 }
 0x7f6   :  { %v1595_v18 = vpop.f32.mrf.mxu0  ;;  %v1636_v35 = vpop.f32.mrf.mxu1 }
 0x7f7   :  { %v1643_v42 = vadd.f32 %v1595_v18, %v3408_v37  ;;  %v1645_v45 = vadd.f32 %v1636_v35, %v3411_v31 }
 0x7f8   :  { %v1597_v40 = vpop.f32.mrf.mxu0  ;;  %v1638_v30 = vpop.f32.mrf.mxu1 }
 0x7f9   :  { %v1962_v46 = vmul.f32 -1.442695, %v1643_v42  ;;  %v1644_v14 = vadd.f32 %v1597_v40, %v3409_v34  ;;  %v1646_v41 = vadd.f32 %v1638_v30, %v3410_v15 }
 0x7fa   :  { %v1599_v25 = vpop.f32.mrf.mxu0  ;;  %v1640_v44 = vpop.f32.mrf.mxu1 }
 0x7fb   :  { %2250 = vpow2.f32 %v1962_v46  ;;  %v1963_v22 = vmul.f32 -1.442695, %v1644_v14  ;;  %v1964_v19 = vmul.f32 -1.442695, %v1646_v41 }
 0x7fc   :  { %v1600_v24 = vpop.f32.mrf.mxu0  ;;  %v1641_v29 = vpop.f32.mrf.mxu1 }
 0x7fd   :  { %2252 = vpow2.f32 %v1963_v22 }
 0x7fe   :  { %2254 = vtanh.f32 %v1645_v45 }
 0x7ff   :  { %2256 = vpow2.f32 %v1964_v19 }
 0x808   :  { %v2251_v0 = vpop.eup %2250 }
 0x809   :  { %v1650_v20 = vadd.f32 1.0, %v2251_v0 }
 0x80a   :  { %v2253_v33 = vpop.eup %2252 }
 0x80b   :  { %2258 = vrcp.f32 %v1650_v20  ;;  %v1656_v49 = vadd.f32 1.0, %v2253_v33  ;;  %v2255_v52 = vpop.eup %2254 }
 0x80c   :  { %v2257_v54 = vpop.eup %2256 }
 0x80d   :  { %2260 = vrcp.f32 %v1656_v49  ;;  %v1663_v1 = vadd.f32 1.0, %v2257_v54 }
 0x80f   :  { %2262 = vrcp.f32 %v1663_v1 }
 0x816   :  { %v1788_v53 = vpop.f32.mrf.mxu0 }
 0x818   :  { %v2259_v55 = vpop.eup %2258  ;;  %v2036_v61 = vpop.f32.mrf.mxu0 }
 0x819   :  { %v1667_v62 = vmul.f32 %v2259_v55, %v2255_v52 }
 0x81a   :  { %v2261_v63 = vpop.eup %2260 }
 0x81b   :  { %v1666_v2 = vmul.f32 %v2261_v63, %v3206_v56 }
 0x81c   :  { %v2263_v4 = vpop.eup %2262 }
 0x81d   :  { %v1668_v3 = vadd.f32 %v1667_v62, %v1666_v2 }
 0x81f   :  { %2264 = vtanh.f32 %v1668_v3 }
 0x82c   :  { %v2265_v5 = vpop.eup %2264 }
 0x82d   :  { %v1670_v6 = vmul.f32 %v2265_v5, %v2263_v4 }
 0x82f   :  { %2070 = vmatmul.mubr.f32.vlgmr.msra.gmra.mxu1 %v1670_v6 }
 0x8ef   :  { %v1858_v7 = vpop.f32.mrf.mxu1 }
 0x8f0   :  { %v1859_v47 = vadd.f32 %v1858_v7, %v1788_v53 }
 0x8f1   :  { %v2071_v9 = vpop.f32.mrf.mxu1 }
 0x8f2   :  { %v1869_v48 = vadd.f32 %v1967_v8, %v1859_v47 }
 0x8f4   :  { %1871 = vst.msk [vmem:[%s3356_s7] sm:$0xff] %vm1870_vm2, %v1869_v48 }
 0x8f5   :  { %1876 = vsyncpa [#allocation4], 1 }

</bundles_post_ra>
